<compile_context>
chip_gen: v5e
topology: v5e:2x2
jax: 0.10.0
libtpu: 0.0.40
codegen_flags: <defaults>
</compile_context>

<pallas_src>
import jax
import jax.numpy as jnp
from jax.experimental import pallas as pl
from jax.experimental.pallas import tpu as pltpu

FEAT_CH = 576          # mobilenet mode -> out_ch = 576
LATENT_DIM = 128       # cfg.latent_dim (synthetic, deterministic choice)
NEG_SLOPE = 0.01       # nn.LeakyReLU default negative_slope


def _cbr_kernel(x_ref, w_ref, b_ref, o_ref):
    # x_ref: (B_TILE, C, thw)  w_ref: (LATENT, C)  b_ref: (LATENT, 1)  o_ref: (B_TILE, LATENT, thw)
    w_bf16 = w_ref[...].astype(jnp.bfloat16)          # resident weight, cast once per step
    bias = b_ref[...]                                  # (LATENT, 1) f32, lane-broadcast
    for b in range(x_ref.shape[0]):                    # static, unrolled over the batch tile
        y = jnp.dot(w_bf16, x_ref[b].astype(jnp.bfloat16),
                    preferred_element_type=jnp.float32)        # (LATENT, thw) f32 acc
        y = y + bias
        o_ref[b] = jnp.maximum(y, NEG_SLOPE * y).astype(o_ref.dtype)


def encoder_cbr(features_nchw, weight, bias, *, lane_budget=1024):
    """1x1 conv (576 -> LATENT_DIM) + LeakyReLU over an NCHW feature map.

    features_nchw: [N, 576, H, W] float32 (bf16 also accepted — cast happens in-kernel)
    weight:        [LATENT_DIM, 576]  (PyTorch Conv2d weight squeezed over the 1x1 kernel)
    bias:          [LATENT_DIM]
    returns:       [N, LATENT_DIM, H, W] float32
    """
    N, C, H, W = features_nchw.shape
    assert C == FEAT_CH
    HW = H * W

    # Flatten spatial dims onto the lane axis (layout-preserving, no data movement).
    x3 = features_nchw.reshape(N, C, HW)

    # Spatial tile: multiple of 128 lanes, capped by the lane budget.  No input padding —
    # Pallas masks the ragged last tile's output stores.
    thw = min(int(lane_budget), pl.cdiv(HW, 128) * 128)
    hw_blocks = pl.cdiv(HW, thw)

    # Batch tile: largest divisor of N that keeps the per-step lane count under budget.
    b_cap = max(1, int(lane_budget) // thw)
    b_tile = min(N, b_cap)
    while N % b_tile:
        b_tile -= 1
    n_blocks = N // b_tile

    # Guarantee >=2 grid steps when possible so both v7x TensorCores get work.
    if n_blocks * hw_blocks < 2:
        if N >= 2:
            b_tile = max(d for d in range(1, N) if N % d == 0)   # largest proper divisor
            n_blocks = N // b_tile
        elif HW > 128:
            thw = pl.cdiv(pl.cdiv(HW, 2), 128) * 128
            hw_blocks = pl.cdiv(HW, thw)

    w2d = weight.astype(jnp.float32)                  # (LATENT, C) — used directly, no transpose
    b2d = bias.astype(jnp.float32).reshape(LATENT_DIM, 1)

    out3 = pl.pallas_call(
        _cbr_kernel,
        out_shape=jax.ShapeDtypeStruct((N, LATENT_DIM, HW), jnp.float32),
        grid_spec=pltpu.PrefetchScalarGridSpec(
            num_scalar_prefetch=0,
            grid=(n_blocks, hw_blocks),
            in_specs=[
                pl.BlockSpec((b_tile, C, thw), lambda n, j: (n, 0, j)),
                pl.BlockSpec((LATENT_DIM, C), lambda n, j: (0, 0)),
                pl.BlockSpec((LATENT_DIM, 1), lambda n, j: (0, 0)),
            ],
            out_specs=pl.BlockSpec((b_tile, LATENT_DIM, thw), lambda n, j: (n, 0, j)),
        ),
        compiler_params=pltpu.CompilerParams(
            dimension_semantics=("parallel", "parallel")),
    )(x3, w2d, b2d)

    # Restore NCHW — layout-preserving glue, no slicing / copies.
    return out3.reshape(N, LATENT_DIM, H, W)


def _reference(features_nchw, weight, bias):
    # pure-JAX reference for the 1x1 conv + LeakyReLU (f32)
    y = jnp.einsum("nchw,oc->nohw", features_nchw, weight) + bias[None, :, None, None]
    return jnp.maximum(y, NEG_SLOPE * y)


if __name__ == "__main__":
    key = jax.random.PRNGKey(0)
    k_feat, k_w, k_b, k_feat2 = jax.random.split(key, 4)

    # Deterministic parameter init for nn.Conv2d(576, latent_dim, kernel_size=1)
    fan_in = FEAT_CH  # * 1 * 1
    bound = 1.0 / (fan_in ** 0.5)
    weight = jax.random.uniform(k_w, (LATENT_DIM, FEAT_CH), jnp.float32, -bound, bound)
    bias = jax.random.uniform(k_b, (LATENT_DIM,), jnp.float32, -bound, bound)

    # Case 1: spatial dims whose product is a multiple of 128.
    Nb, Hf, Wf = 2, 16, 16
    features = jax.random.normal(k_feat, (Nb, FEAT_CH, Hf, Wf), dtype=jnp.float32)
    out = jax.block_until_ready(encoder_cbr(features, weight, bias))
    ref = _reference(features, weight, bias)
    assert out.shape == (Nb, LATENT_DIM, Hf, Wf)
    # bf16 MXU operands -> loosened tolerance vs. the f32 reference
    assert jnp.allclose(out, ref, atol=2e-2, rtol=2e-2), float(jnp.max(jnp.abs(out - ref)))

    # Case 2: realistic MobileNetV3-small spatial size (7x7 -> ragged last tile, no padding).
    Hf2, Wf2 = 7, 7
    features2 = jax.random.normal(k_feat2, (Nb, FEAT_CH, Hf2, Wf2), dtype=jnp.float32)
    out2 = jax.block_until_ready(encoder_cbr(features2, weight, bias))
    ref2 = _reference(features2, weight, bias)
    assert out2.shape == (Nb, LATENT_DIM, Hf2, Wf2)
    assert jnp.allclose(out2, ref2, atol=2e-2, rtol=2e-2), float(jnp.max(jnp.abs(out2 - ref2)))

    print("KERNEL_OK")
</pallas_src>

<mosaic_0001>
module attributes {stable_mosaic.version = 11 : i64} {
  func.func @_cbr_kernel(%arg0: i32, %arg1: i32, %arg2: memref<1x576x256xf32, #tpu.memory_space<vmem>>, %arg3: memref<128x576xf32, #tpu.memory_space<vmem>>, %arg4: memref<128x1xf32, #tpu.memory_space<vmem>>, %arg5: memref<1x128x256xf32, #tpu.memory_space<vmem>>) attributes {dimension_semantics = [#tpu.dimension_semantics<parallel>, #tpu.dimension_semantics<parallel>], iteration_bounds = array<i64: 2, 1>, scalar_prefetch = 0 : i64, scratch_operands = 0 : i64, tpu.core_type = #tpu.core_type<tc>, window_params = [{transform_indices = @transform_0, window_bounds = array<i64: 1, 576, 256>}, {pipeline_mode = #tpu.pipeline_mode<synchronous>, transform_indices = @transform_1, window_bounds = array<i64: 128, 576>}, {pipeline_mode = #tpu.pipeline_mode<synchronous>, transform_indices = @transform_2, window_bounds = array<i64: 128, 1>}, {transform_indices = @transform_3, window_bounds = array<i64: 1, 128, 256>}]} {
    %c0 = arith.constant 0 : index
    %c0_0 = arith.constant 0 : index
    %0 = vector.load %arg3[%c0, %c0_0] : memref<128x576xf32, #tpu.memory_space<vmem>>, vector<128x576xf32>
    %1 = arith.truncf %0 : vector<128x576xf32> to vector<128x576xbf16>
    %c0_1 = arith.constant 0 : index
    %c0_2 = arith.constant 0 : index
    %2 = vector.load %arg4[%c0_1, %c0_2] : memref<128x1xf32, #tpu.memory_space<vmem>>, vector<128x1xf32>
    %c0_3 = arith.constant 0 : index
    %c0_4 = arith.constant 0 : index
    %c0_5 = arith.constant 0 : index
    %3 = vector.load %arg2[%c0_3, %c0_4, %c0_5] : memref<1x576x256xf32, #tpu.memory_space<vmem>>, vector<1x576x256xf32>
    %4 = vector.shape_cast %3 : vector<1x576x256xf32> to vector<576x256xf32>
    %5 = arith.truncf %4 : vector<576x256xf32> to vector<576x256xbf16>
    %cst = arith.constant dense<0.000000e+00> : vector<128x256xf32>
    %6 = tpu.matmul %1, %5, %cst {dimension_numbers = #tpu.dot_dimension_numbers<[1], [0], [0], [1], [0, 0, 1, 1], [], []>} : vector<128x576xbf16>, vector<576x256xbf16>, vector<128x256xf32> -> vector<128x256xf32>
    %7 = vector.broadcast %2 : vector<128x1xf32> to vector<128x256xf32>
    %8 = arith.addf %6, %7 : vector<128x256xf32>
    %cst_6 = arith.constant 0.00999999977 : f32
    %9 = vector.broadcast %cst_6 : f32 to vector<128x256xf32>
    %10 = arith.mulf %9, %8 : vector<128x256xf32>
    %11 = arith.maximumf %8, %10 : vector<128x256xf32>
    %c0_7 = arith.constant 0 : index
    %c0_8 = arith.constant 0 : index
    %c0_9 = arith.constant 0 : index
    %12 = vector.load %arg5[%c0_7, %c0_8, %c0_9] : memref<1x128x256xf32, #tpu.memory_space<vmem>>, vector<1x128x256xf32>
    %13 = vector.shape_cast %12 : vector<1x128x256xf32> to vector<128x256xf32>
    %14 = vector.shape_cast %11 : vector<128x256xf32> to vector<1x128x256xf32>
    tpu.vector_store %arg5[%c0_7, %c0_8, %c0_9], %14 {strides = array<i32>} : memref<1x128x256xf32, #tpu.memory_space<vmem>>, vector<1x128x256xf32>,
    return
  }
  func.func @transform_0(%arg0: i32, %arg1: i32) -> (i32, i32, i32) {
    %c0_i32 = arith.constant 0 : i32
    %c0_i32_0 = arith.constant 0 : i32
    return %arg0, %c0_i32, %arg1 : i32, i32, i32
  }
  func.func @transform_1(%arg0: i32, %arg1: i32) -> (i32, i32) {
    %c0_i32 = arith.constant 0 : i32
    %c0_i32_0 = arith.constant 0 : i32
    %c0_i32_1 = arith.constant 0 : i32
    return %c0_i32, %c0_i32_0 : i32, i32
  }
  func.func @transform_2(%arg0: i32, %arg1: i32) -> (i32, i32) {
    %c0_i32 = arith.constant 0 : i32
    %c0_i32_0 = arith.constant 0 : i32
    %c0_i32_1 = arith.constant 0 : i32
    return %c0_i32, %c0_i32_0 : i32, i32
  }
  func.func @transform_3(%arg0: i32, %arg1: i32) -> (i32, i32, i32) {
    %c0_i32 = arith.constant 0 : i32
    %c0_i32_0 = arith.constant 0 : i32
    return %arg0, %c0_i32, %arg1 : i32, i32, i32
  }
}

</mosaic_0001>

<bundles_post_ra>
// kernel: tpu_custom_call.1
= control target key start
LH: loop header
LB: loop body
LE: loop exit
PB: predicated region body
PF: predicated region fallthrough
CT: control target
= control target key end

     0   :  { %8 = vsyncpa [#allocation3], 0  ;;  %s2567_s0 = inlined_call_operand.hbm [shape: f32[2,576,256], index: 0, kind: input, shape index: {}]   ;;  %s2568_s1 = inlined_call_operand.vmem [shape: f32[128,576], index: 1, kind: input, shape index: {}]   ;;  %s2569_s2 = inlined_call_operand.vmem [shape: f32[128,1], index: 2, kind: input, shape index: {}]   ;;  %s2570_s3 = inlined_call_operand.hbm [shape: f32[2,128,256], index: 3, kind: output, shape index: {}]  }
   0x1   :  { %10 = vsyncpa [#allocation3 + $0x1], 0 }
   0x2   :  { %11 = vsyncpa [#allocation4], 0 }
   0x3   :  { %13 = vsyncpa [#allocation4 + $0x1], 0  ;;  %s1617_s12 = smov 0   ;;  %s1619_s13 = smov 0  }
   0x4   :  { %s1621_s14 = smov 0   ;;  %s1623_s15 = smov 0  }
   0x5   :  { %s1625_s16 = smov 0   ;;  %s1627_s17 = smov 0  }
   0x6 LB: > { %s1360_s18 = sadd.s32 4294967295, %s1590_s17   ;;  %s1361_s19 = sadd.s32 4294967294, %s1590_s17   ;;  %s1590_s17 = sphi %s1627_s17, %s19_s17   ;;  %s1586_s16 = sphi %s1625_s16, %s2636_s16   ;;  %s1582_s15 = sphi %s1623_s15, %s2635_s15   ;;  %s1578_s14 = sphi %s1621_s14, %s2634_s14   ;;  %s1574_s13 = sphi %s1619_s13, %s2633_s13   ;;  %s1570_s12 = sphi %s1617_s12, %s2632_s12  }
   0x7   : > { %s31_s20 = sadd.s32 1, %s1586_s16  ;;  %s40_s21 = sadd.s32 1, %s1578_s14 }
   0x8   : > { %p33_p0 = scmp.ge.s32.totalorder %s31_s20, 2  ;;  %p47_p1 = scmp.ne.s32.totalorder %s1578_s14, %s1574_s13 }
   0x9   : > { %p48_p2 = scmp.eq.s32.totalorder %s1590_s17, 0  ;;  %p53_p3 = scmp.ne.s32.totalorder %s1574_s13, %s1570_s12 }
   0xa   : > { %s2638_s20 = smov (%p33_p0, %s31_s20), 0  ;;  %p54_p5 = scmp.eq.s32.totalorder %s1360_s18, 0 }
   0xb   : > { %p1658_p4 = por %p48_p2, %p47_p1  ;;  %s35_s23 = ssub.s32 %s1586_s16, %s2638_s20 }
   0xc   : > { %p121_p6 = scmp.eq.s32.totalorder %s1360_s18, 1  ;;  %p38_p7 = scmp.eq.s32.totalorder %s35_s23, 0 }
   0xd   : > { %p1664_p8 = por %p54_p5, %p53_p3  ;;  %p127_p10 = scmp.eq.s32.totalorder %s1361_s19, 1 }
   0xe   : > { %p1668_p9 = por %p121_p6, %p47_p1  ;;  %p1363_p12 = scmp.ge.s32.totalorder %s1590_s17, 2 }
   0xf   : > { %s1673_s26 = scalar_select %p38_p7, %s1578_s14, %s40_s21  }
  0x10   : > { %p1675_p11 = por %p127_p10, %p53_p3  ;;  %p1420_p13 = scmp.lt.s32.totalorder %s1590_s17, 2 }
  0x11   : > { %s153_s28 = sand.u32 1, %s1578_s14   ;;  %s1406_s30 = smul.u32 1152, %s1586_s16 }
  0x12   : > { %s1405_s29 = smul.u32 1152, %s153_s28  ;;  %p1413_p0 = pnand %p1420_p13, %p1658_p4 }
  0x13   : > { %s164_s6 = scalar_lea.hbm %s2567_s0, %s1406_s30  ;;  %p1365_p1 = scmp.ge.s32.totalorder %s1590_s17, 1 }
  0x14   : > { %s157_s7 = scalar_lea.vmem [#allocation2], %s1405_s29  ;;  %s165_s9 = sshll.u32 %s164_s6, 4  ;;  %s166_s9 = int_to_ptr.hbm [resolvable:$true] %s165_s9 }
  0x15   : > { %s167_s8 = sshll.u32 %s157_s7, 4  ;;  %s154_s10 = scalar_lea.sflag [#allocation3], %s153_s28  ;;  %s168_s8 = int_to_ptr.vmem [resolvable:$true] %s167_s8 }
  0x16   : > { %s1592_s11 = smov 256   ;;  %s1593_s18 = smov 16  }
  0x17   : > { %1415 = dma.hbm_to_vmem [thread:$0]  (!%p1413_p0), %s166_s9, 18432, %s168_s8, %s154_s10, %s1592_s11, %s1592_s11, %s1593_s18  }
  0x18   : > { %p175_p2 = scmp.lt.s32.totalorder %s1590_s17, 3 }
  0x1a   : > { %p176_p3 = pnand %p1365_p1, %p175_p2 }
  0x1c   : > { %179 = sbr.rel (%p176_p3) target bundleno = 533 (0x215), region = 32 }
  0x21   : > { %s1691_s19 = sand.u32 1, %s1574_s13  }
  0x22   : > { %s1407_s21 = smul.u32 1152, %s1691_s19  ;;  %s182_s22 = scalar_lea.sflag [#allocation3], %s1691_s19 }
  0x24   : > { %s1695_s23 = scalar_lea.vmem [#allocation2], %s1407_s21 }
  0x25   : > { %1561 = dma.done.wait (%p1664_p8), %s182_s22, 18432  }
  0x26   : > { %1563 = vsyncadd (%p1664_p8), %s182_s22, 4294948864  ;;  %v376_v0 = vld [vmem:[%s1695_s23 + $0xe0] sm:$0xff]  ;;  %v378_v1 = vld [vmem:[%s1695_s23 + $0xf0] sm:$0xff]  ;;  %v1594_v7 = vmov 0   ;;  %vm644_vm0 = vcmask 523264   ;;  %s1366_s11 = sshll.u32 %s1691_s19, 8 }
  0x27   : > { %v408_v2 = vld [vmem:[%s1695_s23 + $0x1e0] sm:$0xff]  ;;  %v506_v3 = vpack.c.bf16 %v378_v1, %v376_v0  ;;  %v410_v4 = vld [vmem:[%s1695_s23 + $0x1f0] sm:$0xff]  ;;  %1475 = vset.pattern.permute.xlu0 %v1594_v7  ;;  %1476 = vset.pattern.permute.xlu1 %v1594_v7  ;;  %v333_v37 = vld [vmem:[%s2569_s2 + $0x8] sm:$0xff]  ;;  %s2375_s18 = scalar_lea.vmem [#allocation5], %s1366_s11  ;;  %s1528_s7 = scalar_lea.hbm %s2570_s3, 512 }
  0x28   : > { %v372_v5 = vld [vmem:[%s1695_s23 + $0xc0] sm:$0xff]  ;;  %v374_v6 = vld [vmem:[%s1695_s23 + $0xd0] sm:$0xff]  ;;  %v522_v8 = vpack.c.bf16 %v410_v4, %v408_v2  ;;  %1477 = vset.pattern.permute.xlu2 %v1594_v7  ;;  %v335_v44 = vld [vmem:[%s2569_s2 + $0x18] sm:$0xff]  ;;  %s1270_s28 = sshll.u32 %s2375_s18, 4  ;;  %s1271_s28 = int_to_ptr.vmem [resolvable:$true] %s1270_s28 }
  0x29   : > { %v404_v9 = vld [vmem:[%s1695_s23 + $0x1c0] sm:$0xff]  ;;  %v406_v10 = vld [vmem:[%s1695_s23 + $0x1d0] sm:$0xff]  ;;  %1389 = vmatpush.bf16.msra.mxu2 %v506_v3  ;;  %669 = vmatpush.bf16.msra.mxu0 %v506_v3  ;;  %v504_v11 = vpack.c.bf16 %v374_v6, %v372_v5  ;;  %v257_v53 = vld [vmem:[%s2568_s1 + $0x168] sm:$0xff] }
  0x2a   : > { %1397 = vmatpush.bf16.msra.mxu3 %v522_v8  ;;  %718 = vmatpush.bf16.msra.mxu1 %v522_v8  ;;  %v520_v12 = vpack.c.bf16 %v406_v10, %v404_v9  ;;  %v368_v13 = vld [vmem:[%s1695_s23 + $0xa0] sm:$0xff]  ;;  %v370_v14 = vld [vmem:[%s1695_s23 + $0xb0] sm:$0xff]  ;;  %v253_v56 = vld [vmem:[%s2568_s1 + $0x148] sm:$0xff] }
  0x2b   : > { %v400_v15 = vld [vmem:[%s1695_s23 + $0x1a0] sm:$0xff]  ;;  %v402_v16 = vld [vmem:[%s1695_s23 + $0x1b0] sm:$0xff]  ;;  %v502_v17 = vpack.c.bf16 %v370_v14, %v368_v13  ;;  %v217_v63 = vld [vmem:[%s2568_s1 + $0x28] sm:$0xff] }
  0x2c   : > { %v518_v18 = vpack.c.bf16 %v402_v16, %v400_v15  ;;  %v364_v19 = vld [vmem:[%s1695_s23 + $0x80] sm:$0xff]  ;;  %v366_v20 = vld [vmem:[%s1695_s23 + $0x90] sm:$0xff]  ;;  %v213_v0 = vld [vmem:[%s2568_s1 + $0x8] sm:$0xff] }
  0x2d   : > { %1390 = vmatpush.bf16.msra.mxu2 %v504_v11  ;;  %670 = vmatpush.bf16.msra.mxu0 %v504_v11  ;;  %v396_v21 = vld [vmem:[%s1695_s23 + $0x180] sm:$0xff]  ;;  %v398_v22 = vld [vmem:[%s1695_s23 + $0x190] sm:$0xff]  ;;  %v500_v23 = vpack.c.bf16 %v366_v20, %v364_v19  ;;  %v377_v13 = vld [vmem:[%s1695_s23 + $0xe8] sm:$0xff] }
  0x2e   : > { %1398 = vmatpush.bf16.msra.mxu3 %v520_v12  ;;  %719 = vmatpush.bf16.msra.mxu1 %v520_v12  ;;  %v516_v24 = vpack.c.bf16 %v398_v22, %v396_v21  ;;  %v360_v25 = vld [vmem:[%s1695_s23 + $0x60] sm:$0xff]  ;;  %v362_v26 = vld [vmem:[%s1695_s23 + $0x70] sm:$0xff]  ;;  %v379_v14 = vld [vmem:[%s1695_s23 + $0xf8] sm:$0xff] }
  0x2f   : > { %v332_v27 = vld [vmem:[%s2569_s2] sm:$0xff]  ;;  %v394_v29 = vld [vmem:[%s1695_s23 + $0x170] sm:$0xff]  ;;  %v498_v30 = vpack.c.bf16 %v362_v26, %v360_v25  ;;  %v507_v22 = vpack.c.bf16 %v379_v14, %v377_v13 }
  0x30   : > { %v392_v28 = vld [vmem:[%s1695_s23 + $0x160] sm:$0xff]  ;;  %566 = vperm.xlu0 %1475, %v332_v27   ;;  %v334_v31 = vld [vmem:[%s2569_s2 + $0x10] sm:$0xff]  ;;  %v373_v27 = vld [vmem:[%s1695_s23 + $0xc8] sm:$0xff] }
  0x31   : > { %1391 = vmatpush.bf16.msra.mxu2 %v502_v17  ;;  %671 = vmatpush.bf16.msra.mxu0 %v502_v17  ;;  %v514_v32 = vpack.c.bf16 %v394_v29, %v392_v28  ;;  %v356_v33 = vld [vmem:[%s1695_s23 + $0x40] sm:$0xff]  ;;  %v358_v34 = vld [vmem:[%s1695_s23 + $0x50] sm:$0xff]  ;;  %v375_v28 = vld [vmem:[%s1695_s23 + $0xd8] sm:$0xff] }
  0x32   : > { %1399 = vmatpush.bf16.msra.mxu3 %v518_v18  ;;  %720 = vmatpush.bf16.msra.mxu1 %v518_v18  ;;  %v388_v35 = vld [vmem:[%s1695_s23 + $0x140] sm:$0xff]  ;;  %v390_v36 = vld [vmem:[%s1695_s23 + $0x150] sm:$0xff]  ;;  %v496_v38 = vpack.c.bf16 %v358_v34, %v356_v33  ;;  %v339_v29 = vld [vmem:[%s2569_s2 + $0x38] sm:$0xff] }
  0x33   : > { %576 = vperm.xlu1 %1476, %v334_v31   ;;  %v512_v39 = vpack.c.bf16 %v390_v36, %v388_v35  ;;  %v352_v40 = vld [vmem:[%s1695_s23 + $0x20] sm:$0xff]  ;;  %v354_v41 = vld [vmem:[%s1695_s23 + $0x30] sm:$0xff]  ;;  %v337_v33 = vld [vmem:[%s2569_s2 + $0x28] sm:$0xff]  ;;  %v505_v35 = vpack.c.bf16 %v375_v28, %v373_v27 }
  0x34   : > { %v384_v42 = vld [vmem:[%s1695_s23 + $0x120] sm:$0xff]  ;;  %v386_v43 = vld [vmem:[%s1695_s23 + $0x130] sm:$0xff]  ;;  %v494_v45 = vpack.c.bf16 %v354_v41, %v352_v40  ;;  %v369_v40 = vld [vmem:[%s1695_s23 + $0xa8] sm:$0xff] }
  0x35   : > { %1392 = vmatpush.bf16.msra.mxu2 %v500_v23  ;;  %672 = vmatpush.bf16.msra.mxu0 %v500_v23  ;;  %v348_v46 = vld [vmem:[%s1695_s23] sm:$0xff]  ;;  %v350_v47 = vld [vmem:[%s1695_s23 + $0x10] sm:$0xff]  ;;  %v510_v48 = vpack.c.bf16 %v386_v43, %v384_v42  ;;  %v371_v41 = vld [vmem:[%s1695_s23 + $0xb8] sm:$0xff] }
  0x36   : > { %1400 = vmatpush.bf16.msra.mxu3 %v516_v24  ;;  %721 = vmatpush.bf16.msra.mxu1 %v516_v24  ;;  %v380_v49 = vld [vmem:[%s1695_s23 + $0x100] sm:$0xff]  ;;  %v382_v50 = vld [vmem:[%s1695_s23 + $0x110] sm:$0xff]  ;;  %v492_v61 = vpack.c.bf16 %v350_v47, %v348_v46  ;;  %v267_v46 = vld [vmem:[%s2568_s1 + $0x1b8] sm:$0xff] }
  0x37   : > { %v336_v51 = vld [vmem:[%s2569_s2 + $0x20] sm:$0xff]  ;;  %v442_v55 = vld [vmem:[%s1695_s23 + $0x2f0] sm:$0xff]  ;;  %v508_v1 = vpack.c.bf16 %v382_v50, %v380_v49  ;;  %v357_v27 = vld [vmem:[%s1695_s23 + $0x48] sm:$0xff] }
  0x38   : > { %571 = vperm.xlu0 %1475, %v333_v37   ;;  %v252_v52 = vld [vmem:[%s2568_s1 + $0x140] sm:$0xff]  ;;  %586 = vperm.xlu2 %1477, %v336_v51   ;;  %v258_v57 = vld [vmem:[%s2568_s1 + $0x170] sm:$0xff]  ;;  %v359_v28 = vld [vmem:[%s1695_s23 + $0x58] sm:$0xff] }
  0x39   : > { %1393 = vmatpush.bf16.msra.mxu2 %v498_v30  ;;  %673 = vmatpush.bf16.msra.mxu0 %v498_v30  ;;  %v440_v54 = vld [vmem:[%s1695_s23 + $0x2e0] sm:$0xff]  ;;  %v474_v59 = vld [vmem:[%s1695_s23 + $0x3f0] sm:$0xff]  ;;  %v1784_v10 = vpack.c.bf16 %v257_v53, %v252_v52  ;;  %v1791_v15 = vpack.c.bf16 %v258_v57, %v253_v56  ;;  %v341_v30 = vld [vmem:[%s2569_s2 + $0x48] sm:$0xff] }
  0x3a   : > { %1401 = vmatpush.bf16.msra.mxu3 %v514_v32  ;;  %722 = vmatpush.bf16.msra.mxu1 %v514_v32  ;;  %v472_v58 = vld [vmem:[%s1695_s23 + $0x3e0] sm:$0xff]  ;;  %v338_v60 = vld [vmem:[%s2569_s2 + $0x30] sm:$0xff]  ;;  %v538_v2 = vpack.c.bf16 %v442_v55, %v440_v54  ;;  %v263_v53 = vld [vmem:[%s2568_s1 + $0x198] sm:$0xff] }
  0x3b   : > { %581 = vperm.xlu1 %1476, %v335_v44   ;;  %v212_v62 = vld [vmem:[%s2568_s1] sm:$0xff]  ;;  %v218_v3 = vld [vmem:[%s2568_s1 + $0x30] sm:$0xff]  ;;  %v554_v6 = vpack.c.bf16 %v474_v59, %v472_v58  ;;  %v365_v56 = vld [vmem:[%s1695_s23 + $0x88] sm:$0xff] }
  0x3c   : > { %v488_v4 = vld [vmem:[%s1695_s23 + $0x460] sm:$0xff]  ;;  %v490_v5 = vld [vmem:[%s1695_s23 + $0x470] sm:$0xff]  ;;  %v1786_v11 = vpack.c.bf16 %v217_v63, %v212_v62  ;;  %v1793_v17 = vpack.c.bf16 %v218_v3, %v213_v0  ;;  %v367_v57 = vld [vmem:[%s1695_s23 + $0x98] sm:$0xff] }
  0x3d   : > { %1394 = vmatpush.bf16.msra.mxu2 %v496_v38  ;;  %674 = vmatpush.bf16.msra.mxu0 %v496_v38  ;;  %v436_v7 = vld [vmem:[%s1695_s23 + $0x2c0] sm:$0xff]  ;;  %v438_v8 = vld [vmem:[%s1695_s23 + $0x2d0] sm:$0xff]  ;;  %v562_v16 = vpack.c.bf16 %v490_v5, %v488_v4  ;;  %v227_v59 = vld [vmem:[%s2568_s1 + $0x78] sm:$0xff] }
  0x3e   : > { %1402 = vmatpush.bf16.msra.mxu3 %v512_v39  ;;  %723 = vmatpush.bf16.msra.mxu1 %v512_v39  ;;  %v468_v9 = vld [vmem:[%s1695_s23 + $0x3c0] sm:$0xff]  ;;  %v470_v12 = vld [vmem:[%s1695_s23 + $0x3d0] sm:$0xff]  ;;  %v536_v18 = vpack.c.bf16 %v438_v8, %v436_v7 }
  0x3f   : > { %v484_v19 = vld [vmem:[%s1695_s23 + $0x440] sm:$0xff]  ;;  %v486_v20 = vld [vmem:[%s1695_s23 + $0x450] sm:$0xff]  ;;  %v552_v21 = vpack.c.bf16 %v470_v12, %v468_v9  ;;  %v361_v9 = vld [vmem:[%s1695_s23 + $0x68] sm:$0xff] }
  0x40   : > { %596 = vperm.xlu0 %1475, %v338_v60   ;;  %v432_v23 = vld [vmem:[%s1695_s23 + $0x2a0] sm:$0xff]  ;;  %v434_v24 = vld [vmem:[%s1695_s23 + $0x2b0] sm:$0xff]  ;;  %v560_v31 = vpack.c.bf16 %v486_v20, %v484_v19  ;;  %591 = vperm.xlu2 %1477, %v337_v33   ;;  %v363_v12 = vld [vmem:[%s1695_s23 + $0x78] sm:$0xff] }
  0x41   : > { %1395 = vmatpush.bf16.msra.mxu2 %v494_v45  ;;  %675 = vmatpush.bf16.msra.mxu0 %v494_v45  ;;  %v464_v25 = vld [vmem:[%s1695_s23 + $0x3a0] sm:$0xff]  ;;  %v466_v26 = vld [vmem:[%s1695_s23 + $0x3b0] sm:$0xff]  ;;  %v534_v32 = vpack.c.bf16 %v434_v24, %v432_v23  ;;  %v499_v19 = vpack.c.bf16 %v363_v12, %v361_v9 }
  0x42   : > { %1403 = vmatpush.bf16.msra.mxu3 %v510_v48  ;;  %724 = vmatpush.bf16.msra.mxu1 %v510_v48  ;;  %v550_v34 = vpack.c.bf16 %v466_v26, %v464_v25  ;;  %v428_v36 = vld [vmem:[%s1695_s23 + $0x280] sm:$0xff]  ;;  %v430_v37 = vld [vmem:[%s1695_s23 + $0x290] sm:$0xff]  ;;  %v503_v48 = vpack.c.bf16 %v371_v41, %v369_v40 }
  0x43   : > { %v460_v38 = vld [vmem:[%s1695_s23 + $0x380] sm:$0xff]  ;;  %601 = vperm.xlu1 %1476, %v339_v29   ;;  %v462_v39 = vld [vmem:[%s1695_s23 + $0x390] sm:$0xff]  ;;  %v532_v42 = vpack.c.bf16 %v430_v37, %v428_v36  ;;  %v497_v29 = vpack.c.bf16 %v359_v28, %v357_v27  ;;  %v405_v28 = vld [vmem:[%s1695_s23 + $0x1c8] sm:$0xff] }
  0x44   : > { %v480_v43 = vld [vmem:[%s1695_s23 + $0x420] sm:$0xff]  ;;  %v482_v44 = vld [vmem:[%s1695_s23 + $0x430] sm:$0xff]  ;;  %v548_v47 = vpack.c.bf16 %v462_v39, %v460_v38  ;;  %v353_v38 = vld [vmem:[%s1695_s23 + $0x28] sm:$0xff] }
  0x45   : > { %1396 = vmatpush.bf16.msra.mxu2 %v492_v61  ;;  %676 = vmatpush.bf16.msra.mxu0 %v492_v61  ;;  %v262_v45 = vld [vmem:[%s2568_s1 + $0x190] sm:$0xff]  ;;  %v424_v49 = vld [vmem:[%s1695_s23 + $0x260] sm:$0xff]  ;;  %v558_v52 = vpack.c.bf16 %v482_v44, %v480_v43  ;;  %v223_v61 = vld [vmem:[%s2568_s1 + $0x58] sm:$0xff] }
  0x46   : > { %1404 = vmatpush.bf16.msra.mxu3 %v508_v1  ;;  %725 = vmatpush.bf16.msra.mxu1 %v508_v1  ;;  %v426_v50 = vld [vmem:[%s1695_s23 + $0x270] sm:$0xff]  ;;  %v456_v51 = vld [vmem:[%s1695_s23 + $0x360] sm:$0xff]  ;;  %v355_v39 = vld [vmem:[%s1695_s23 + $0x38] sm:$0xff] }
  0x47   : > { %v268_v54 = vld [vmem:[%s2568_s1 + $0x1c0] sm:$0xff]  ;;  %v458_v55 = vld [vmem:[%s1695_s23 + $0x370] sm:$0xff]  ;;  %v530_v63 = vpack.c.bf16 %v426_v50, %v424_v49  ;;  %v277_v44 = vld [vmem:[%s2568_s1 + $0x208] sm:$0xff] }
  0x48   : > { %697 = vmatmul.bf16.vlgmr.msra.gmra.mxu2 %v1784_v10  ;;  %677 = vmatmul.bf16.vlgmr.msra.gmra.mxu0 %v1786_v11  ;;  %v222_v58 = vld [vmem:[%s2568_s1 + $0x50] sm:$0xff]  ;;  %v228_v62 = vld [vmem:[%s2568_s1 + $0x80] sm:$0xff]  ;;  %v546_v1 = vpack.c.bf16 %v458_v55, %v456_v51  ;;  %v1870_v13 = vpack.c.bf16 %v268_v54, %v263_v53  ;;  %v233_v49 = vld [vmem:[%s2568_s1 + $0xa8] sm:$0xff] }
  0x49   : > { %767 = vmatpush.bf16.msrb.mxu2 %v538_v2  ;;  %746 = vmatmul.bf16.vlgmr.msra.gmra.mxu3 %v1791_v15  ;;  %v342_v60 = vld [vmem:[%s2569_s2 + $0x50] sm:$0xff]  ;;  %v340_v0 = vld [vmem:[%s2569_s2 + $0x40] sm:$0xff]  ;;  %v501_v2 = vpack.c.bf16 %v367_v57, %v365_v56  ;;  %v1865_v7 = vpack.c.bf16 %v227_v59, %v222_v58  ;;  %v1872_v14 = vpack.c.bf16 %v228_v62, %v223_v61  ;;  %v349_v55 = vld [vmem:[%s1695_s23 + $0x8] sm:$0xff] }
  0x4a   : > { %816 = vmatpush.bf16.msrb.mxu3 %v554_v6  ;;  %869 = vmatpush.bf16.msrb.mxu0 %v562_v16  ;;  %v420_v3 = vld [vmem:[%s1695_s23 + $0x240] sm:$0xff]  ;;  %v422_v4 = vld [vmem:[%s1695_s23 + $0x250] sm:$0xff]  ;;  %v1863_v6 = vpack.c.bf16 %v267_v46, %v262_v45  ;;  %v237_v46 = vld [vmem:[%s2568_s1 + $0xc8] sm:$0xff] }
  0x4b   : > { %726 = vmatmul.bf16.vlgmr.msra.gmra.mxu1 %v1793_v17  ;;  %611 = vperm.xlu0 %1475, %v341_v30   ;;  %v452_v5 = vld [vmem:[%s1695_s23 + $0x340] sm:$0xff]  ;;  %v454_v8 = vld [vmem:[%s1695_s23 + $0x350] sm:$0xff]  ;;  %v528_v16 = vpack.c.bf16 %v422_v4, %v420_v3  ;;  %v351_v56 = vld [vmem:[%s1695_s23 + $0x18] sm:$0xff] }
  0x4c   : > { %914 = vmatpush.bf16.msrb.mxu1 %v507_v22  ;;  %616 = vperm.xlu1 %1476, %v342_v60   ;;  %v416_v20 = vld [vmem:[%s1695_s23 + $0x220] sm:$0xff]  ;;  %v450_v25 = vld [vmem:[%s1695_s23 + $0x330] sm:$0xff]  ;;  %v493_v57 = vpack.c.bf16 %v351_v56, %v349_v55  ;;  %v409_v58 = vld [vmem:[%s1695_s23 + $0x1e8] sm:$0xff] }
  0x4d   : > { %768 = vmatpush.bf16.msrb.mxu2 %v536_v18  ;;  %606 = vperm.xlu2 %1477, %v340_v0   ;;  %v544_v18 = vpack.c.bf16 %v454_v8, %v452_v5  ;;  %v344_v22 = vld [vmem:[%s2569_s2 + $0x60] sm:$0xff]  ;;  %v478_v37 = vld [vmem:[%s1695_s23 + $0x410] sm:$0xff]  ;;  %v411_v59 = vld [vmem:[%s1695_s23 + $0x1f8] sm:$0xff] }
  0x4e   : > { %817 = vmatpush.bf16.msrb.mxu3 %v552_v21  ;;  %870 = vmatpush.bf16.msrb.mxu0 %v560_v31  ;;  %v418_v21 = vld [vmem:[%s1695_s23 + $0x230] sm:$0xff]  ;;  %v448_v24 = vld [vmem:[%s1695_s23 + $0x320] sm:$0xff]  ;;  %v343_v60 = vld [vmem:[%s2569_s2 + $0x58] sm:$0xff]  ;;  %v523_v61 = vpack.c.bf16 %v411_v59, %v409_v58 }
  0x4f   : > { %v526_v23 = vpack.c.bf16 %v418_v21, %v416_v20  ;;  %v542_v26 = vpack.c.bf16 %v450_v25, %v448_v24  ;;  %v412_v30 = vld [vmem:[%s1695_s23 + $0x200] sm:$0xff]  ;;  %v414_v31 = vld [vmem:[%s1695_s23 + $0x210] sm:$0xff]  ;;  %v441_v62 = vld [vmem:[%s1695_s23 + $0x2e8] sm:$0xff] }
  0x50   : > { %915 = vmatpush.bf16.msrb.mxu1 %v505_v35  ;;  %v444_v33 = vld [vmem:[%s1695_s23 + $0x300] sm:$0xff]  ;;  %v524_v36 = vpack.c.bf16 %v414_v31, %v412_v30  ;;  %v238_v50 = vld [vmem:[%s2568_s1 + $0xd0] sm:$0xff]  ;;  %v347_v0 = vld [vmem:[%s2569_s2 + $0x78] sm:$0xff] }
  0x51   : > { %769 = vmatpush.bf16.msrb.mxu2 %v534_v32  ;;  %v345_v32 = vld [vmem:[%s2569_s2 + $0x68] sm:$0xff]  ;;  %v476_v35 = vld [vmem:[%s1695_s23 + $0x400] sm:$0xff]  ;;  %v1928_v54 = vpack.c.bf16 %v238_v50, %v233_v49  ;;  %v475_v3 = vld [vmem:[%s1695_s23 + $0x3f8] sm:$0xff] }
  0x52   : > { %818 = vmatpush.bf16.msrb.mxu3 %v550_v34  ;;  %871 = vmatpush.bf16.msrb.mxu0 %v558_v52  ;;  %v446_v34 = vld [vmem:[%s1695_s23 + $0x310] sm:$0xff]  ;;  %v556_v41 = vpack.c.bf16 %v478_v37, %v476_v35  ;;  %v272_v43 = vld [vmem:[%s2568_s1 + $0x1e0] sm:$0xff]  ;;  %v489_v4 = vld [vmem:[%s1695_s23 + $0x468] sm:$0xff] }
  0x53   : > { %626 = vperm.xlu0 %1475, %v344_v22   ;;  %v540_v40 = vpack.c.bf16 %v446_v34, %v444_v33  ;;  %v232_v45 = vld [vmem:[%s2568_s1 + $0xa0] sm:$0xff]  ;;  %v1922_v51 = vpack.c.bf16 %v277_v44, %v272_v43  ;;  %v491_v8 = vld [vmem:[%s1695_s23 + $0x478] sm:$0xff]  ;;  %v282_v12 = vld [vmem:[%s2568_s1 + $0x230] sm:$0xff] }
  0x54   : > { %916 = vmatpush.bf16.msrb.mxu1 %v503_v48  ;;  %631 = vperm.xlu1 %1476, %v345_v32   ;;  %v278_v48 = vld [vmem:[%s2568_s1 + $0x210] sm:$0xff]  ;;  %v1924_v52 = vpack.c.bf16 %v237_v46, %v232_v45  ;;  %v563_v9 = vpack.c.bf16 %v491_v8, %v489_v4  ;;  %v283_v20 = vld [vmem:[%s2568_s1 + $0x238] sm:$0xff]  ;;  %v288_v21 = vld [vmem:[%s2568_s1 + $0x260] sm:$0xff] }
  0x55   : > { %770 = vmatpush.bf16.msrb.mxu2 %v532_v42  ;;  %v495_v42 = vpack.c.bf16 %v355_v39, %v353_v38  ;;  %621 = vperm.xlu2 %1477, %v343_v60   ;;  %v243_v22 = vld [vmem:[%s2568_s1 + $0xf8] sm:$0xff]  ;;  %v437_v30 = vld [vmem:[%s1695_s23 + $0x2c8] sm:$0xff]  ;;  %v346_v33 = vld [vmem:[%s2569_s2 + $0x70] sm:$0xff] }
  0x56   : > { %819 = vmatpush.bf16.msrb.mxu3 %v548_v47  ;;  %872 = vmatpush.bf16.msrb.mxu0 %v556_v41  ;;  %v273_v47 = vld [vmem:[%s2568_s1 + $0x1e8] sm:$0xff]  ;;  %v439_v32 = vld [vmem:[%s1695_s23 + $0x2d8] sm:$0xff]  ;;  %v214_v38 = vld [vmem:[%s2568_s1 + $0x10] sm:$0xff] }
  0x57   : > { %v1926_v53 = vpack.c.bf16 %v278_v48, %v273_v47  ;;  %v469_v34 = vld [vmem:[%s1695_s23 + $0x3c8] sm:$0xff]  ;;  %v537_v35 = vpack.c.bf16 %v439_v32, %v437_v30  ;;  %v219_v39 = vld [vmem:[%s2568_s1 + $0x38] sm:$0xff]  ;;  %v220_v43 = vld [vmem:[%s2568_s1 + $0x40] sm:$0xff] }
  0x58   : > { %917 = vmatpush.bf16.msrb.mxu1 %v501_v2  ;;  %702 = vmatmul.bf16.gmra.mxu2 %v1863_v6  ;;  %v473_v2 = vld [vmem:[%s1695_s23 + $0x3e8] sm:$0xff]  ;;  %v2013_v44 = vpack.c.bf16 %v219_v39, %v214_v38  ;;  %v403_v48 = vld [vmem:[%s1695_s23 + $0x1b8] sm:$0xff]  ;;  %v240_v32 = vld [vmem:[%s2568_s1 + $0xe0] sm:$0xff] }
  0x59   : > { %771 = vmatpush.bf16.msrb.mxu2 %v530_v63  ;;  %682 = vmatmul.bf16.gmra.mxu0 %v1865_v7  ;;  %2592 = vst [vmem:[#allocation8_spill] sm:$0xff] %v1926_v53  ;;  %v443_v63 = vld [vmem:[%s1695_s23 + $0x2f8] sm:$0xff]  ;;  %v555_v5 = vpack.c.bf16 %v475_v3, %v473_v2  ;;  %v221_v41 = vld [vmem:[%s2568_s1 + $0x48] sm:$0xff]  ;;  %v230_v3 = vld [vmem:[%s2568_s1 + $0x90] sm:$0xff] }
  0x5a   : > { %820 = vmatpush.bf16.msrb.mxu3 %v546_v1  ;;  %v539_v1 = vpack.c.bf16 %v443_v63, %v441_v62  ;;  %v401_v47 = vld [vmem:[%s1695_s23 + $0x1a8] sm:$0xff]  ;;  %v435_v55 = vld [vmem:[%s1695_s23 + $0x2b8] sm:$0xff] }
  0x5b   : > { %751 = vmatmul.bf16.gmra.mxu3 %v1870_v13  ;;  %731 = vmatmul.bf16.gmra.mxu1 %v1872_v14  ;;  %v433_v49 = vld [vmem:[%s1695_s23 + $0x2a8] sm:$0xff]  ;;  %v519_v50 = vpack.c.bf16 %v403_v48, %v401_v47  ;;  %v459_v47 = vld [vmem:[%s1695_s23 + $0x378] sm:$0xff] }
  0x5c   : > { %918 = vmatpush.bf16.msrb.mxu1 %v499_v19  ;;  %641 = vperm.xlu0 %1475, %v347_v0   ;;  %v247_v19 = vld [vmem:[%s2568_s1 + $0x118] sm:$0xff]  ;;  %v465_v56 = vld [vmem:[%s1695_s23 + $0x3a8] sm:$0xff]  ;;  %v535_v58 = vpack.c.bf16 %v435_v55, %v433_v49  ;;  %v226_v0 = vld [vmem:[%s2568_s1 + $0x70] sm:$0xff] }
  0x5d   : > { %772 = vmatpush.bf16.msrb.mxu2 %v528_v16  ;;  %1061 = vmatpush.bf16.msra.mxu0 %v555_v5  ;;  %v287_v16 = vld [vmem:[%s2568_s1 + $0x258] sm:$0xff]  ;;  %v485_v60 = vld [vmem:[%s1695_s23 + $0x448] sm:$0xff] }
  0x5e   : > { %821 = vmatpush.bf16.msrb.mxu3 %v544_v18  ;;  %v242_v18 = vld [vmem:[%s2568_s1 + $0xf0] sm:$0xff]  ;;  %v1974_v24 = vpack.c.bf16 %v287_v16, %v282_v12  ;;  %636 = vperm.xlu2 %1477, %v346_v33   ;;  %v229_v63 = vld [vmem:[%s2568_s1 + $0x88] sm:$0xff]  ;;  %v399_v12 = vld [vmem:[%s1695_s23 + $0x198] sm:$0xff] }
  0x5f   : > { %v1976_v25 = vpack.c.bf16 %v247_v19, %v242_v18  ;;  %v225_v2 = vld [vmem:[%s2568_s1 + $0x68] sm:$0xff]  ;;  %v431_v19 = vld [vmem:[%s1695_s23 + $0x298] sm:$0xff] }
  0x60   : > { %919 = vmatpush.bf16.msrb.mxu1 %v497_v29  ;;  %v407_v29 = vld [vmem:[%s1695_s23 + $0x1d8] sm:$0xff]  ;;  %v2054_v8 = vpack.c.bf16 %v230_v3, %v225_v2  ;;  %v429_v16 = vld [vmem:[%s1695_s23 + $0x288] sm:$0xff] }
  0x61   : > { %773 = vmatpush.bf16.msrb.mxu2 %v526_v23  ;;  %v248_v23 = vld [vmem:[%s2568_s1 + $0x120] sm:$0xff]  ;;  %v521_v31 = vpack.c.bf16 %v407_v29, %v405_v28  ;;  %v234_v28 = vld [vmem:[%s2568_s1 + $0xb0] sm:$0xff]  ;;  %v241_v30 = vld [vmem:[%s2568_s1 + $0xe8] sm:$0xff] }
  0x62   : > { %822 = vmatpush.bf16.msrb.mxu3 %v542_v26  ;;  %v1978_v26 = vpack.c.bf16 %v288_v21, %v283_v20  ;;  %v1980_v27 = vpack.c.bf16 %v248_v23, %v243_v22  ;;  %v461_v20 = vld [vmem:[%s1695_s23 + $0x388] sm:$0xff]  ;;  %v463_v21 = vld [vmem:[%s1695_s23 + $0x398] sm:$0xff]  ;;  %v533_v22 = vpack.c.bf16 %v431_v19, %v429_v16  ;;  %v236_v29 = vld [vmem:[%s2568_s1 + $0xc0] sm:$0xff] }
  0x63   : > { %v549_v23 = vpack.c.bf16 %v463_v21, %v461_v20  ;;  %v425_v38 = vld [vmem:[%s1695_s23 + $0x268] sm:$0xff]  ;;  %v251_v49 = vld [vmem:[%s2568_s1 + $0x138] sm:$0xff]  ;;  %v254_v20 = vld [vmem:[%s2568_s1 + $0x150] sm:$0xff] }
  0x64   : > { %920 = vmatpush.bf16.msrb.mxu1 %v495_v42  ;;  %2593 = vst [vmem:[#allocation9_spill] sm:$0xff] %v1978_v26  ;;  %v215_v42 = vld [vmem:[%s2568_s1 + $0x18] sm:$0xff]  ;;  %v249_v48 = vld [vmem:[%s2568_s1 + $0x128] sm:$0xff] }
  0x65   : > { %774 = vmatpush.bf16.msrb.mxu2 %v524_v36  ;;  %v471_v36 = vld [vmem:[%s1695_s23 + $0x3d8] sm:$0xff]  ;;  %v2017_v46 = vpack.c.bf16 %v220_v43, %v215_v42  ;;  %v244_v42 = vld [vmem:[%s2568_s1 + $0x100] sm:$0xff]  ;;  %v457_v43 = vld [vmem:[%s1695_s23 + $0x368] sm:$0xff] }
  0x66   : > { %823 = vmatpush.bf16.msrb.mxu3 %v540_v40  ;;  %v553_v37 = vpack.c.bf16 %v471_v36, %v469_v34  ;;  %v216_v40 = vld [vmem:[%s2568_s1 + $0x20] sm:$0xff]  ;;  %v2087_v34 = vpack.c.bf16 %v241_v30, %v236_v29  ;;  %v393_v36 = vld [vmem:[%s1695_s23 + $0x168] sm:$0xff]  ;;  %v255_v29 = vld [vmem:[%s2568_s1 + $0x158] sm:$0xff] }
  0x67   : > { %v2015_v45 = vpack.c.bf16 %v221_v41, %v216_v40  ;;  %v427_v40 = vld [vmem:[%s1695_s23 + $0x278] sm:$0xff]  ;;  %v245_v55 = vld [vmem:[%s2568_s1 + $0x108] sm:$0xff]  ;;  %v260_v30 = vld [vmem:[%s2568_s1 + $0x180] sm:$0xff] }
  0x68   : > { %707 = vmatmul.bf16.gmra.mxu2 %v1922_v51  ;;  %921 = vmatpush.bf16.msrb.mxu1 %v493_v57  ;;  %v467_v57 = vld [vmem:[%s1695_s23 + $0x3b8] sm:$0xff]  ;;  %v531_v41 = vpack.c.bf16 %v427_v40, %v425_v38  ;;  %v421_v2 = vld [vmem:[%s1695_s23 + $0x248] sm:$0xff] }
  0x69   : > { %687 = vmatmul.bf16.gmra.mxu0 %v1924_v52  ;;  %963 = vmatpush.bf16.msra.mxu2 %v523_v61  ;;  %v551_v59 = vpack.c.bf16 %v467_v57, %v465_v56  ;;  %v487_v61 = vld [vmem:[%s1695_s23 + $0x458] sm:$0xff]  ;;  %v250_v56 = vld [vmem:[%s2568_s1 + $0x130] sm:$0xff]  ;;  %v453_v21 = vld [vmem:[%s1695_s23 + $0x348] sm:$0xff] }
  0x6a   : > { %1012 = vmatpush.bf16.msra.mxu3 %v539_v1  ;;  %1062 = vmatpush.bf16.msra.mxu0 %v553_v37  ;;  %v561_v62 = vpack.c.bf16 %v487_v61, %v485_v60  ;;  %v231_v1 = vld [vmem:[%s2568_s1 + $0x98] sm:$0xff]  ;;  %v2126_v60 = vpack.c.bf16 %v250_v56, %v245_v55 }
  0x6b   : > { %756 = vmatmul.bf16.gmra.mxu3 %v1926_v53  ;;  %736 = vmatmul.bf16.gmra.mxu1 %v1928_v54  ;;  %v2052_v5 = vpack.c.bf16 %v231_v1, %v226_v0  ;;  %v395_v37 = vld [vmem:[%s1695_s23 + $0x178] sm:$0xff]  ;;  %v389_v0 = vld [vmem:[%s1695_s23 + $0x148] sm:$0xff] }
  0x6c   : > { %1114 = vmatpush.bf16.msra.mxu1 %v563_v9  ;;  %v397_v9 = vld [vmem:[%s1695_s23 + $0x188] sm:$0xff]  ;;  %v515_v39 = vpack.c.bf16 %v395_v37, %v393_v36  ;;  %v391_v1 = vld [vmem:[%s1695_s23 + $0x158] sm:$0xff]  ;;  %v2173_v37 = vpack.c.bf16 %v260_v30, %v255_v29 }
  0x6d   : > { %964 = vmatpush.bf16.msra.mxu2 %v521_v31  ;;  %v517_v18 = vpack.c.bf16 %v399_v12, %v397_v9  ;;  %v235_v31 = vld [vmem:[%s2568_s1 + $0xb8] sm:$0xff]  ;;  %v513_v3 = vpack.c.bf16 %v391_v1, %v389_v0  ;;  %v449_v1 = vld [vmem:[%s1695_s23 + $0x328] sm:$0xff] }
  0x6e   : > { %1013 = vmatpush.bf16.msra.mxu3 %v537_v35  ;;  %1063 = vmatpush.bf16.msra.mxu0 %v551_v59  ;;  %v2089_v35 = vpack.c.bf16 %v240_v32, %v235_v31  ;;  %v423_v9 = vld [vmem:[%s1695_s23 + $0x258] sm:$0xff] }
  0x6f   : > { %v529_v16 = vpack.c.bf16 %v423_v9, %v421_v2  ;;  %v451_v2 = vld [vmem:[%s1695_s23 + $0x338] sm:$0xff]  ;;  %v269_v9 = vld [vmem:[%s2568_s1 + $0x1c8] sm:$0xff] }
  0x70   : > { %1115 = vmatpush.bf16.msra.mxu1 %v561_v62  ;;  %v481_v62 = vld [vmem:[%s1695_s23 + $0x428] sm:$0xff] }
  0x71   : > { %965 = vmatpush.bf16.msra.mxu2 %v519_v50  ;;  %v547_v50 = vpack.c.bf16 %v459_v47, %v457_v43  ;;  %v387_v43 = vld [vmem:[%s1695_s23 + $0x138] sm:$0xff]  ;;  %v417_v47 = vld [vmem:[%s1695_s23 + $0x228] sm:$0xff] }
  0x72   : > { %1014 = vmatpush.bf16.msra.mxu3 %v535_v58  ;;  %1064 = vmatpush.bf16.msra.mxu0 %v549_v23  ;;  %v2122_v58 = vpack.c.bf16 %v249_v48, %v244_v42  ;;  %v256_v23 = vld [vmem:[%s2568_s1 + $0x160] sm:$0xff]  ;;  %v385_v42 = vld [vmem:[%s1695_s23 + $0x128] sm:$0xff] }
  0x73   : > { %v511_v48 = vpack.c.bf16 %v387_v43, %v385_v42 }
  0x75   : > { %966 = vmatpush.bf16.msra.mxu2 %v517_v18 }
  0x76   : > { %1015 = vmatpush.bf16.msra.mxu3 %v533_v22  ;;  %1065 = vmatpush.bf16.msra.mxu0 %v547_v50  ;;  %v455_v22 = vld [vmem:[%s1695_s23 + $0x358] sm:$0xff] }
  0x78   : > { %712 = vmatmul.bf16.gmra.mxu2 %v1974_v24 }
  0x79   : > { %692 = vmatmul.bf16.gmra.mxu0 %v1976_v25  ;;  %967 = vmatpush.bf16.msra.mxu2 %v515_v39 }
  0x7a   : > { %1016 = vmatpush.bf16.msra.mxu3 %v531_v41 }
  0x7b   : > { %761 = vmatmul.bf16.gmra.mxu3 %v1978_v26  ;;  %741 = vmatmul.bf16.gmra.mxu1 %v1980_v27 }
  0x7d   : > { %968 = vmatpush.bf16.msra.mxu2 %v513_v3 }
  0x7e   : > { %1017 = vmatpush.bf16.msra.mxu3 %v529_v16  ;;  %v266_v16 = vld [vmem:[%s2568_s1 + $0x1b0] sm:$0xff] }
  0x81   : > { %969 = vmatpush.bf16.msra.mxu2 %v511_v48  ;;  %v477_v48 = vld [vmem:[%s1695_s23 + $0x408] sm:$0xff] }
  0x88   : > { %775 = vmatmul.bf16.vlgmr.msrb.gmra.mxu2 %v2013_v44 }
  0x89   : > { %1367 = vmatmul.msk.bf16.vlgmr.msrb.gmra.mxu0 %vm644_vm0, %v2015_v45 }
  0x8b   : > { %824 = vmatmul.bf16.vlgmr.msrb.gmra.mxu3 %v2017_v46  ;;  %922 = vmatmul.bf16.vlgmr.msrb.gmra.mxu1 %v1786_v11  ;;  %v224_v11 = vld [vmem:[%s2568_s1 + $0x60] sm:$0xff] }
  0x8c   : > { %v2050_v4 = vpack.c.bf16 %v229_v63, %v224_v11  ;;  %v483_v11 = vld [vmem:[%s1695_s23 + $0x438] sm:$0xff] }
  0x8d   : > { %v559_v63 = vpack.c.bf16 %v483_v11, %v481_v62 }
  0x8f   : > { %1116 = vmatpush.bf16.msra.mxu1 %v559_v63 }
  0x92   : > { %v2128_v61 = vpop.permute.xlu2 %586 }
  0x98   : > { %780 = vmatmul.bf16.gmra.mxu2 %v2050_v4 }
  0x99   : > { %1368 = vmatmul.msk.bf16.gmra.mxu0 %vm644_vm0, %v2052_v5 }
  0x9a   : > { %v2145_v19 = vpop.permute.xlu2 %591 }
  0x9b   : > { %829 = vmatmul.bf16.gmra.mxu3 %v2054_v8  ;;  %927 = vmatmul.bf16.gmra.mxu1 %v1865_v7  ;;  %v239_v7 = vld [vmem:[%s2568_s1 + $0xd8] sm:$0xff] }
  0x9c   : > { %v2085_v33 = vpack.c.bf16 %v239_v7, %v234_v28  ;;  %v261_v28 = vld [vmem:[%s2568_s1 + $0x188] sm:$0xff]  ;;  %v545_v7 = vpack.c.bf16 %v455_v22, %v453_v21  ;;  %v543_v21 = vpack.c.bf16 %v451_v2, %v449_v1 }
  0x9d   : > { %v2169_v32 = vpack.c.bf16 %v261_v28, %v256_v23  ;;  %v265_v22 = vld [vmem:[%s2568_s1 + $0x1a8] sm:$0xff] }
  0x9e   : > { %1066 = vmatpush.bf16.msra.mxu0 %v545_v7  ;;  %v413_v1 = vld [vmem:[%s1695_s23 + $0x208] sm:$0xff] }
  0xa2   : > { %v2120_v57 = vpop.permute.xlu0 %566  ;;  %1067 = vmatpush.bf16.msra.mxu0 %v543_v21 }
  0xa3   : > { %2594 = vst [vmem:[#allocation10_spill] sm:$0xff] %v2120_v57 }
  0xa5   : > { %v2141_v12 = vpop.permute.xlu1 %576 }
  0xa7   : > { %v2185_v41 = vpop.permute.xlu2 %606 }
  0xa8   : > { %785 = vmatmul.bf16.gmra.mxu2 %v2085_v33  ;;  %2595 = vst [vmem:[#allocation11_spill] sm:$0xff] %v2185_v41 }
  0xa9   : > { %1369 = vmatmul.msk.bf16.gmra.mxu0 %vm644_vm0, %v2087_v34 }
  0xaa   : > { %v2143_v18 = vpop.permute.xlu0 %571 }
  0xab   : > { %834 = vmatmul.bf16.gmra.mxu3 %v2089_v35  ;;  %932 = vmatmul.bf16.gmra.mxu1 %v1924_v52  ;;  %v246_v52 = vld [vmem:[%s2568_s1 + $0x110] sm:$0xff] }
  0xac   : > { %v2124_v59 = vpack.c.bf16 %v251_v49, %v246_v52  ;;  %v419_v52 = vld [vmem:[%s1695_s23 + $0x238] sm:$0xff] }
  0xad   : > { %v2175_v38 = vpop.permute.xlu1 %581  ;;  %v527_v50 = vpack.c.bf16 %v419_v52, %v417_v47  ;;  %v479_v52 = vld [vmem:[%s1695_s23 + $0x418] sm:$0xff] }
  0xaf   : > { %1018 = vmatpush.bf16.msra.mxu3 %v527_v50  ;;  %v557_v50 = vpack.c.bf16 %v479_v52, %v477_v48  ;;  %v447_v48 = vld [vmem:[%s1695_s23 + $0x318] sm:$0xff]  ;;  %v2261_v52 = vpop.permute.xlu2 %621 }
  0xb0   : > { %2598 = vst [vmem:[#allocation14_spill] sm:$0xff] %v2261_v52 }
  0xb1   : > { %1117 = vmatpush.bf16.msra.mxu1 %v557_v50  ;;  %v279_v50 = vld [vmem:[%s2568_s1 + $0x218] sm:$0xff] }
  0xb2   : > { %v2179_v40 = vpop.permute.xlu0 %596 }
  0xb5   : > { %v2199_v0 = vpop.permute.xlu1 %601 }
  0xb8   : > { %790 = vmatmul.bf16.gmra.mxu2 %v2122_v58 }
  0xb9   : > { %1370 = vmatmul.msk.bf16.gmra.mxu0 %vm644_vm0, %v2124_v59 }
  0xbb   : > { %839 = vmatmul.bf16.gmra.mxu3 %v2126_v60  ;;  %937 = vmatmul.bf16.gmra.mxu1 %v1976_v25  ;;  %v259_v25 = vld [vmem:[%s2568_s1 + $0x178] sm:$0xff] }
  0xbc   : > { %v2167_v31 = vpack.c.bf16 %v259_v25, %v254_v20  ;;  %v271_v20 = vld [vmem:[%s2568_s1 + $0x1d8] sm:$0xff]  ;;  %v270_v25 = vld [vmem:[%s2568_s1 + $0x1d0] sm:$0xff] }
  0xbd   : > { %v2206_v3 = vpop.permute.xlu0 %611  ;;  %v2226_v30 = vpack.c.bf16 %v271_v20, %v266_v16  ;;  %v2230_v43 = vpack.c.bf16 %v270_v25, %v265_v22 }
  0xbe   : > { %2596 = vst [vmem:[#allocation12_spill] sm:$0xff] %v2206_v3 }
  0xc5   : > { %v2171_v36 = vpop.f32.mrf.mxu0 }
  0xc8   : > { %v2177_v39 = vpop.f32.mrf.mxu1  ;;  %795 = vmatmul.bf16.gmra.mxu2 %v2167_v31 }
  0xc9   : > { %1371 = vmatmul.msk.bf16.gmra.mxu0 %vm644_vm0, %v2169_v32 }
  0xcb   : > { %844 = vmatmul.bf16.gmra.mxu3 %v2173_v37  ;;  %942 = vmatmul.bf16.gmra.mxu1 %v1784_v10  ;;  %v698_v49 = vpop.f32.mrf.mxu2  ;;  %v264_v10 = vld [vmem:[%s2568_s1 + $0x1a0] sm:$0xff] }
  0xcc   : > { %v699_v55 = vadd.f32 %v698_v49, %v2185_v41  ;;  %v747_v56 = vpop.f32.mrf.mxu3  ;;  %v2224_v29 = vpack.c.bf16 %v269_v9, %v264_v10  ;;  %v383_v10 = vld [vmem:[%s1695_s23 + $0x118] sm:$0xff] }
  0xcd   : > { %v2193_v62 = vpop.f32.mrf.mxu0  ;;  %v415_v9 = vld [vmem:[%s1695_s23 + $0x218] sm:$0xff] }
  0xce   : > { %v2195_v11 = vadd.f32 %v747_v56, %v699_v55  ;;  %v2242_v55 = vpop.permute.xlu1 %616  ;;  %v381_v56 = vld [vmem:[%s1695_s23 + $0x108] sm:$0xff]  ;;  %v525_v20 = vpack.c.bf16 %v415_v9, %v413_v1  ;;  %v280_v9 = vld [vmem:[%s2568_s1 + $0x220] sm:$0xff] }
  0xcf   : > { %2597 = vst [vmem:[#allocation13_spill] sm:$0xff] %v2242_v55  ;;  %v509_v2 = vpack.c.bf16 %v383_v10, %v381_v56  ;;  %v276_v56 = vld [vmem:[%s2568_s1 + $0x200] sm:$0xff]  ;;  %v281_v10 = vld [vmem:[%s2568_s1 + $0x228] sm:$0xff] }
  0xd0   : > { %v2197_v63 = vpop.f32.mrf.mxu1  ;;  %1019 = vmatpush.bf16.msra.mxu3 %v525_v20 }
  0xd1   : > { %970 = vmatpush.bf16.msra.mxu2 %v509_v2  ;;  %v275_v2 = vld [vmem:[%s2568_s1 + $0x1f8] sm:$0xff] }
  0xd3   : > { %v700_v23 = vpop.f32.mrf.mxu2 }
  0xd4   : > { %v701_v28 = vadd.f32 %v700_v23, %v2206_v3  ;;  %v749_v7 = vpop.f32.mrf.mxu3 }
  0xd6   : > { %v2228_v42 = vpop.f32.mrf.mxu0  ;;  %v2232_v47 = vadd.f32 %v749_v7, %v701_v28  ;;  %v274_v7 = vld [vmem:[%s2568_s1 + $0x1f0] sm:$0xff] }
  0xd8   : > { %v2236_v49 = vpop.f32.mrf.mxu1  ;;  %800 = vmatmul.bf16.gmra.mxu2 %v2224_v29 }
  0xd9   : > { %1372 = vmatmul.msk.bf16.gmra.mxu0 %vm644_vm0, %v2226_v30 }
  0xdb   : > { %849 = vmatmul.bf16.gmra.mxu3 %v2230_v43  ;;  %947 = vmatmul.bf16.gmra.mxu1 %v1863_v6  ;;  %v703_v16 = vpop.f32.mrf.mxu2  ;;  %v445_v6 = vld [vmem:[%s1695_s23 + $0x308] sm:$0xff]  ;;  %s1388_s23 = sshll.u32 %s1582_s15, 8  ;;  %s1256_s15 = scalar_lea.sflag [#allocation4], %s1691_s19 }
  0xdc   : > { %v704_v21 = vadd.f32 %v703_v16, %v2242_v55  ;;  %v541_v1 = vpack.c.bf16 %v447_v48, %v445_v6  ;;  %v2281_v55 = vpack.c.bf16 %v281_v10, %v276_v56  ;;  %v2285_v6 = vpack.c.bf16 %v280_v9, %v275_v2  ;;  %s1269_s24 = scalar_lea.hbm %s2570_s3, %s1388_s23 }
  0xdd   : > { %s1272_s29 = sshll.u32 %s1269_s24, 4  ;;  %s1273_s29 = int_to_ptr.hbm [resolvable:$true] %s1272_s29 }
  0xde   : > { %v752_v22 = vpop.f32.mrf.mxu3  ;;  %v2250_v25 = vpop.f32.mrf.mxu0  ;;  %1068 = vmatpush.bf16.msra.mxu0 %v541_v1  ;;  %2600 = vst [vmem:[#allocation16_spill] sm:$0xff] %v2281_v55  ;;  %s1522_s30 = sshra.s32 %s1273_s29, 4  ;;  %s1523_s30 = int_to_ptr.hbm [resolvable:$true] %s1522_s30 }
  0xdf   : > { %v2252_v23 = vadd.f32 %v752_v22, %v704_v21  ;;  %v2279_v22 = vpack.c.bf16 %v279_v50, %v274_v7  ;;  %2601 = vst [vmem:[#allocation17_spill] sm:$0xff] %v2285_v6  ;;  %v2295_v1 = vpop.permute.xlu0 %626  ;;  %s1524_s4 = scalar_lea.hbm %s1523_s30, 256  ;;  %p1529_p7 = scmp.lt.s32.totalorder %s1523_s30, %s2570_s3 }
  0xe0   : > { %v2254_v28 = vpop.f32.mrf.mxu1  ;;  %2603 = vst [vmem:[#allocation19_spill] sm:$0xff] %v2295_v1  ;;  %p1525_p4 = scmp.ne.s32.totalorder %s1523_s30, %s1524_s4  ;;  %p1530_p8 = scmp.lt.s32.totalorder %s1528_s7, %s1524_s4 }
  0xe1   : > { %2599 = vst [vmem:[#allocation15_spill] sm:$0xff] %v2279_v22 }
  0xe2   : > { %p1526_p5 = pnand %p1525_p4, %p1668_p9  ;;  %p1531_p10 = por %p1530_p8, %p1529_p7 }
  0xe3   : > { %v705_v16 = vpop.f32.mrf.mxu2 }
  0xe4   : > { %v706_v20 = vadd.f32 %v705_v16, %v2261_v52  ;;  %v284_v16 = vld [vmem:[%s2568_s1 + $0x240] sm:$0xff]  ;;  %p1527_p6 = pneg %p1526_p5 }
  0xe6   : > { %v754_v21 = vpop.f32.mrf.mxu3  ;;  %v2283_v3 = vpop.f32.mrf.mxu0  ;;  %p1532_p13 = pnand %p1531_p10, %p1527_p6 }
  0xe7   : > { %v2287_v48 = vadd.f32 %v754_v21, %v706_v20  ;;  %v2308_v20 = vpop.permute.xlu1 %631  ;;  %v286_v21 = vld [vmem:[%s2568_s1 + $0x250] sm:$0xff] }
  0xe8   : > { %v2289_v41 = vpop.f32.mrf.mxu1  ;;  %805 = vmatmul.bf16.gmra.mxu2 %v2279_v22  ;;  %2605 = vst [vmem:[#allocation21_spill] sm:$0xff] %v2308_v20 }
  0xe9   : > { %2602 = vst [vmem:[#allocation18_spill] sm:$0xff] %v2287_v48  ;;  %1373 = vmatmul.msk.bf16.gmra.mxu0 %vm644_vm0, %v2281_v55 }
  0xeb   : > { %854 = vmatmul.bf16.gmra.mxu3 %v2285_v6  ;;  %952 = vmatmul.bf16.gmra.mxu1 %v1922_v51  ;;  %v708_v7 = vpop.f32.mrf.mxu2  ;;  %v289_v51 = vld [vmem:[%s2568_s1 + $0x268] sm:$0xff] }
  0xec   : > { %v709_v50 = vadd.f32 %v708_v7, %v2295_v1  ;;  %v291_v7 = vld [vmem:[%s2568_s1 + $0x278] sm:$0xff] }
  0xed   : > { %v2328_v55 = vpack.c.bf16 %v291_v7, %v286_v21 }
  0xee   : > { %v757_v56 = vpop.f32.mrf.mxu3  ;;  %v2299_v10 = vpop.f32.mrf.mxu0 }
  0xef   : > { %v2301_v2 = vadd.f32 %v757_v56, %v709_v50  ;;  %v285_v50 = vld [vmem:[%s2568_s1 + $0x248] sm:$0xff]  ;;  %v290_v56 = vld [vmem:[%s2568_s1 + $0x270] sm:$0xff]  ;;  %2607 = vst [vmem:[#allocation23_spill] sm:$0xff] %v2328_v55 }
  0xf0   : > { %v2303_v9 = vpop.f32.mrf.mxu1  ;;  %v2332_v6 = vpack.c.bf16 %v290_v56, %v285_v50  ;;  %v2352_v50 = vpop.permute.xlu0 %641 }
  0xf1   : > { %2604 = vst [vmem:[#allocation20_spill] sm:$0xff] %v2301_v2  ;;  %v2326_v2 = vpack.c.bf16 %v289_v51, %v284_v16 }
  0xf2   : > { %2608 = vst [vmem:[#allocation24_spill] sm:$0xff] %v2332_v6 }
  0xf3   : > { %v710_v1 = vpop.f32.mrf.mxu2  ;;  %2606 = vst [vmem:[#allocation22_spill] sm:$0xff] %v2326_v2 }
  0xf4   : > { %v711_v52 = vadd.f32 %v710_v1, %v2308_v20  ;;  %v2342_v1 = vpop.permute.xlu2 %636  ;;  %2610 = vst [vmem:[#allocation26_spill] sm:$0xff] %v2352_v50 }
  0xf5   : > { %2609 = vst [vmem:[#allocation25_spill] sm:$0xff] %v2342_v1 }
  0xf6   : > { %v759_v26 = vpop.f32.mrf.mxu3  ;;  %v2330_v22 = vpop.f32.mrf.mxu0 }
  0xf7   : > { %v2334_v53 = vadd.f32 %v759_v26, %v711_v52 }
  0xf8   : > { %v2336_v48 = vpop.f32.mrf.mxu1  ;;  %810 = vmatmul.bf16.gmra.mxu2 %v2326_v2 }
  0xf9   : > { %1374 = vmatmul.msk.bf16.gmra.mxu0 %vm644_vm0, %v2328_v55 }
  0xfb   : > { %859 = vmatmul.bf16.gmra.mxu3 %v2332_v6  ;;  %957 = vmatmul.bf16.gmra.mxu1 %v1974_v24  ;;  %v713_v16 = vpop.f32.mrf.mxu2  ;;  %v679_v24 = vadd.f32 %v2171_v36, %v2120_v57  ;;  %v681_v36 = vadd.f32 %v2193_v62, %v2143_v18 }
  0xfc   : > { %v714_v51 = vadd.f32 %v713_v16, %v2342_v1 }
  0xfe   : > { %v762_v21 = vpop.f32.mrf.mxu3  ;;  %v2346_v7 = vpop.f32.mrf.mxu0 }
  0xff   : > { %v2348_v26 = vadd.f32 %v762_v21, %v714_v51  ;;  %v728_v51 = vadd.f32 %v2177_v39, %v679_v24 }
 0x100   : > { %v2350_v52 = vpop.f32.mrf.mxu1 }
 0x103   : > { %v715_v56 = vpop.f32.mrf.mxu2 }
 0x104   : > { %v716_v20 = vadd.f32 %v715_v56, %v2352_v50 }
 0x106   : > { %v764_v55 = vpop.f32.mrf.mxu3  ;;  %v874_v2 = vpop.f32.mrf.mxu0 }
 0x107   : > { %v2357_v6 = vadd.f32 %v764_v55, %v716_v20 }
 0x108   : > { %v2359_v16 = vpop.f32.mrf.mxu1  ;;  %971 = vmatmul.bf16.vlgmr.msra.gmra.mxu2 %v1793_v17 }
 0x109   : > { %2611 = vst [vmem:[#allocation27_spill] sm:$0xff] %v2359_v16  ;;  %1069 = vmatmul.bf16.vlgmr.msra.gmra.mxu0 %v2017_v46  ;;  %v730_v46 = vadd.f32 %v2197_v63, %v681_v36 }
 0x10b   : > { %1020 = vmatmul.bf16.vlgmr.msra.gmra.mxu3 %v2013_v44  ;;  %1375 = vmatmul.msk.bf16.vlgmr.msra.gmra.mxu1 %vm644_vm0, %v2015_v45  ;;  %v776_v21 = vpop.f32.mrf.mxu2 }
 0x10c   : > { %v777_v56 = vadd.f32 %v776_v21, %v728_v51  ;;  %v684_v51 = vadd.f32 %v2228_v42, %v2141_v12 }
 0x10e   : > { %v825_v50 = vpop.f32.mrf.mxu3  ;;  %v876_v1 = vpop.f32.mrf.mxu0  ;;  %v733_v63 = vadd.f32 %v2236_v49, %v684_v51 }
 0x10f   : > { %v826_v55 = vadd.f32 %v825_v50, %v777_v56 }
 0x110   : > { %v2369_v20 = vpop.f32.mrf.mxu1 }
 0x111   : > { %v875_v17 = vadd.f32 %v874_v2, %v826_v55 }
 0x113   : > { %v1159_v44 = vmul.f32 0.01, %v875_v17  ;;  %v778_v16 = vpop.f32.mrf.mxu2 }
 0x114   : > { %v779_v24 = vadd.f32 %v778_v16, %v730_v46 }
 0x115   : > { %v1191_v39 = vmax.f32 %v875_v17, %v1159_v44 }
 0x116   : > { %v827_v57 = vpop.f32.mrf.mxu3  ;;  %v879_v45 = vpop.f32.mrf.mxu0 }
 0x117   : > { %1223 = vst [vmem:[%s2375_s18] sm:$0xff] %v1191_v39  ;;  %v828_v62 = vadd.f32 %v827_v57, %v779_v24  ;;  %v689_v24 = vadd.f32 %v2283_v3, %v2128_v61 }
 0x118   : > { %v2378_v50 = vpop.f32.mrf.mxu1  ;;  %976 = vmatmul.bf16.gmra.mxu2 %v1872_v14 }
 0x119   : > { %v877_v2 = vadd.f32 %v876_v1, %v828_v62  ;;  %1074 = vmatmul.bf16.gmra.mxu0 %v2054_v8  ;;  %v686_v1 = vadd.f32 %v2250_v25, %v2175_v38 }
 0x11b   : > { %1025 = vmatmul.bf16.gmra.mxu3 %v2050_v4  ;;  %v1161_v16 = vmul.f32 0.01, %v877_v2  ;;  %1376 = vmatmul.msk.bf16.gmra.mxu1 %vm644_vm0, %v2052_v5  ;;  %v781_v42 = vpop.f32.mrf.mxu2  ;;  %v735_v49 = vadd.f32 %v2254_v28, %v686_v1  ;;  %v738_v28 = vadd.f32 %v2289_v41, %v689_v24  ;;  %v696_v24 = vadd.f32 %v2346_v7, %v2199_v0 }
 0x11c   : > { %v782_v56 = vadd.f32 %v781_v42, %v733_v63 }
 0x11d   : > { %v1193_v21 = vmax.f32 %v877_v2, %v1161_v16 }
 0x11e   : > { %v830_v57 = vpop.f32.mrf.mxu3  ;;  %v881_v36 = vpop.f32.mrf.mxu0 }
 0x11f   : > { %1225 = vst [vmem:[%s2375_s18 + $0x10] sm:$0xff] %v1193_v21  ;;  %v831_v14 = vadd.f32 %v830_v57, %v782_v56  ;;  %v691_v21 = vadd.f32 %v2299_v10, %v2145_v19 }
 0x120   : > { %v2389_v8 = vpop.f32.mrf.mxu1 }
 0x121   : > { %v880_v4 = vadd.f32 %v879_v45, %v831_v14  ;;  %v740_v41 = vadd.f32 %v2303_v9, %v691_v21 }
 0x123   : > { %v1163_v55 = vmul.f32 0.01, %v880_v4  ;;  %v783_v17 = vpop.f32.mrf.mxu2 }
 0x124   : > { %v784_v5 = vadd.f32 %v783_v17, %v735_v49 }
 0x125   : > { %v1195_v46 = vmax.f32 %v880_v4, %v1163_v55  ;;  %v694_v4 = vadd.f32 %v2330_v22, %v2179_v40 }
 0x126   : > { %v832_v44 = vpop.f32.mrf.mxu3  ;;  %v884_v39 = vpop.f32.mrf.mxu0 }
 0x127   : > { %1227 = vst [vmem:[%s2375_s18 + $0x20] sm:$0xff] %v1195_v46  ;;  %v833_v51 = vadd.f32 %v832_v44, %v784_v5  ;;  %v743_v9 = vadd.f32 %v2336_v48, %v694_v4  ;;  %v745_v48 = vadd.f32 %v2350_v52, %v696_v24 }
 0x128   : > { %v2395_v25 = vpop.f32.mrf.mxu1  ;;  %981 = vmatmul.bf16.gmra.mxu2 %v1928_v54 }
 0x129   : > { %v882_v62 = vadd.f32 %v881_v36, %v833_v51  ;;  %1079 = vmatmul.bf16.gmra.mxu0 %v2089_v35 }
 0x12b   : > { %1030 = vmatmul.bf16.gmra.mxu3 %v2085_v33  ;;  %v1165_v45 = vmul.f32 0.01, %v882_v62  ;;  %1377 = vmatmul.msk.bf16.gmra.mxu1 %vm644_vm0, %v2087_v34  ;;  %v786_v2 = vpop.f32.mrf.mxu2 }
 0x12c   : > { %v787_v63 = vadd.f32 %v786_v2, %v738_v28 }
 0x12d   : > { %v1197_v3 = vmax.f32 %v882_v62, %v1165_v45 }
 0x12e   : > { %v835_v16 = vpop.f32.mrf.mxu3  ;;  %v886_v42 = vpop.f32.mrf.mxu0 }
 0x12f   : > { %1229 = vst [vmem:[%s2375_s18 + $0x30] sm:$0xff] %v1197_v3  ;;  %v836_v54 = vadd.f32 %v835_v16, %v787_v63 }
 0x130   : > { %v2406_v35 = vpop.f32.mrf.mxu1 }
 0x131   : > { %v885_v33 = vadd.f32 %v884_v39, %v836_v54 }
 0x133   : > { %v1167_v56 = vmul.f32 0.01, %v885_v33  ;;  %v788_v57 = vpop.f32.mrf.mxu2 }
 0x134   : > { %v789_v34 = vadd.f32 %v788_v57, %v740_v41 }
 0x135   : > { %v1199_v36 = vmax.f32 %v885_v33, %v1167_v56 }
 0x136   : > { %v837_v1 = vpop.f32.mrf.mxu3  ;;  %v889_v14 = vpop.f32.mrf.mxu0 }
 0x137   : > { %1231 = vst [vmem:[%s2375_s18 + $0x40] sm:$0xff] %v1199_v36  ;;  %v838_v49 = vadd.f32 %v837_v1, %v789_v34 }
 0x138   : > { %v2412_v10 = vpop.f32.mrf.mxu1  ;;  %986 = vmatmul.bf16.gmra.mxu2 %v1980_v27 }
 0x139   : > { %v887_v55 = vadd.f32 %v886_v42, %v838_v49  ;;  %1084 = vmatmul.bf16.gmra.mxu0 %v2126_v60 }
 0x13b   : > { %1035 = vmatmul.bf16.gmra.mxu3 %v2122_v58  ;;  %v1169_v17 = vmul.f32 0.01, %v887_v55  ;;  %1378 = vmatmul.msk.bf16.gmra.mxu1 %vm644_vm0, %v2124_v59  ;;  %v791_v46 = vpop.f32.mrf.mxu2 }
 0x13c   : > { %v792_v5 = vadd.f32 %v791_v46, %v743_v9 }
 0x13d   : > { %v1201_v22 = vmax.f32 %v887_v55, %v1169_v17 }
 0x13e   : > { %v840_v44 = vpop.f32.mrf.mxu3  ;;  %v891_v39 = vpop.f32.mrf.mxu0 }
 0x13f   : > { %1233 = vst [vmem:[%s2375_s18 + $0x50] sm:$0xff] %v1201_v22  ;;  %v841_v27 = vadd.f32 %v840_v44, %v792_v5 }
 0x140   : > { %v2423_v60 = vpop.f32.mrf.mxu1 }
 0x141   : > { %v890_v58 = vadd.f32 %v889_v14, %v841_v27 }
 0x143   : > { %v1171_v51 = vmul.f32 0.01, %v890_v58  ;;  %v793_v62 = vpop.f32.mrf.mxu2 }
 0x144   : > { %v794_v59 = vadd.f32 %v793_v62, %v745_v48  ;;  %v2613_v48 = vld [vmem:[#allocation8_spill] sm:$0xff]  ;;  %v2615_v62 = vld [vmem:[#allocation15_spill] sm:$0xff] }
 0x145   : > { %v1203_v28 = vmax.f32 %v890_v58, %v1171_v51  ;;  %v2614_v51 = vld [vmem:[#allocation17_spill] sm:$0xff] }
 0x146   : > { %v842_v45 = vpop.f32.mrf.mxu3  ;;  %v894_v2 = vpop.f32.mrf.mxu0 }
 0x147   : > { %1235 = vst [vmem:[%s2375_s18 + $0x60] sm:$0xff] %v1203_v28  ;;  %v843_v3 = vadd.f32 %v842_v45, %v794_v59  ;;  %v2616_v59 = vld [vmem:[#allocation16_spill] sm:$0xff] }
 0x148   : > { %v2427_v63 = vpop.f32.mrf.mxu1  ;;  %991 = vmatmul.bf16.gmra.mxu2 %v1791_v15 }
 0x149   : > { %v892_v16 = vadd.f32 %v891_v39, %v843_v3  ;;  %1089 = vmatmul.bf16.gmra.mxu0 %v2173_v37  ;;  %v2617_v3 = vld [vmem:[#allocation20_spill] sm:$0xff] }
 0x14b   : > { %1040 = vmatmul.bf16.gmra.mxu3 %v2167_v31  ;;  %v1173_v7 = vmul.f32 0.01, %v892_v16  ;;  %1379 = vmatmul.msk.bf16.gmra.mxu1 %vm644_vm0, %v2169_v32  ;;  %v796_v52 = vpop.f32.mrf.mxu2 }
 0x14c   : > { %v797_v21 = vadd.f32 %v796_v52, %v2195_v11 }
 0x14d   : > { %v1205_v42 = vmax.f32 %v892_v16, %v1173_v7 }
 0x14e   : > { %v845_v54 = vpop.f32.mrf.mxu3  ;;  %v896_v33 = vpop.f32.mrf.mxu0 }
 0x14f   : > { %1237 = vst [vmem:[%s2375_s18 + $0x70] sm:$0xff] %v1205_v42  ;;  %v846_v41 = vadd.f32 %v845_v54, %v797_v21 }
 0x150   : > { %v2436_v56 = vpop.f32.mrf.mxu1 }
 0x151   : > { %v895_v15 = vadd.f32 %v894_v2, %v846_v41 }
 0x153   : > { %v1175_v57 = vmul.f32 0.01, %v895_v15  ;;  %v798_v37 = vpop.f32.mrf.mxu2 }
 0x154   : > { %v799_v31 = vadd.f32 %v798_v37, %v2232_v47 }
 0x155   : > { %v1207_v36 = vmax.f32 %v895_v15, %v1175_v57 }
 0x156   : > { %v847_v34 = vpop.f32.mrf.mxu3  ;;  %v899_v32 = vpop.f32.mrf.mxu0 }
 0x157   : > { %1239 = vst [vmem:[%s2375_s18 + $0x80] sm:$0xff] %v1207_v36  ;;  %v848_v1 = vadd.f32 %v847_v34, %v799_v31 }
 0x158   : > { %v2440_v14 = vpop.f32.mrf.mxu1  ;;  %996 = vmatmul.bf16.gmra.mxu2 %v1870_v13 }
 0x159   : > { %v897_v11 = vadd.f32 %v896_v33, %v848_v1  ;;  %1094 = vmatmul.bf16.gmra.mxu0 %v2230_v43  ;;  %v2618_v1 = vld [vmem:[#allocation9_spill] sm:$0xff] }
 0x15b   : > { %1045 = vmatmul.bf16.gmra.mxu3 %v2224_v29  ;;  %v1177_v4 = vmul.f32 0.01, %v897_v11  ;;  %1380 = vmatmul.msk.bf16.gmra.mxu1 %vm644_vm0, %v2226_v30  ;;  %v801_v47 = vpop.f32.mrf.mxu2  ;;  %v2612_v29 = vld [vmem:[#allocation18_spill] sm:$0xff] }
 0x15c   : > { %v802_v55 = vadd.f32 %v801_v47, %v2252_v23 }
 0x15d   : > { %v1209_v49 = vmax.f32 %v897_v11, %v1177_v4  ;;  %v2619_v11 = vld [vmem:[#allocation24_spill] sm:$0xff]  ;;  %v2620_v4 = vld [vmem:[#allocation22_spill] sm:$0xff] }
 0x15e   : > { %v850_v9 = vpop.f32.mrf.mxu3  ;;  %v901_v17 = vpop.f32.mrf.mxu0 }
 0x15f   : > { %1241 = vst [vmem:[%s2375_s18 + $0x90] sm:$0xff] %v1209_v49  ;;  %v851_v46 = vadd.f32 %v850_v9, %v802_v55  ;;  %v2621_v49 = vld [vmem:[#allocation23_spill] sm:$0xff] }
 0x160   : > { %v2449_v22 = vpop.f32.mrf.mxu1 }
 0x161   : > { %v900_v13 = vadd.f32 %v899_v32, %v851_v46 }
 0x163   : > { %v1179_v5 = vmul.f32 0.01, %v900_v13  ;;  %v803_v43 = vpop.f32.mrf.mxu2 }
 0x164   : > { %v804_v39 = vadd.f32 %v803_v43, %v2612_v29 }
 0x165   : > { %v1211_v44 = vmax.f32 %v900_v13, %v1179_v5 }
 0x166   : > { %v852_v24 = vpop.f32.mrf.mxu3  ;;  %v904_v30 = vpop.f32.mrf.mxu0 }
 0x167   : > { %1243 = vst [vmem:[%s2375_s18 + $0xa0] sm:$0xff] %v1211_v44  ;;  %v853_v27 = vadd.f32 %v852_v24, %v804_v39 }
 0x168   : > { %v2453_v58 = vpop.f32.mrf.mxu1  ;;  %1001 = vmatmul.bf16.gmra.mxu2 %v2613_v48 }
 0x169   : > { %v902_v23 = vadd.f32 %v901_v17, %v853_v27  ;;  %1099 = vmatmul.bf16.gmra.mxu0 %v2614_v51 }
 0x16b   : > { %1050 = vmatmul.bf16.gmra.mxu3 %v2615_v62  ;;  %v1181_v28 = vmul.f32 0.01, %v902_v23  ;;  %1381 = vmatmul.msk.bf16.gmra.mxu1 %vm644_vm0, %v2616_v59  ;;  %v806_v45 = vpop.f32.mrf.mxu2  ;;  %v2623_v62 = vld [vmem:[#allocation27_spill] sm:$0xff] }
 0x16c   : > { %v807_v16 = vadd.f32 %v806_v45, %v2617_v3 }
 0x16d   : > { %v1213_v2 = vmax.f32 %v902_v23, %v1181_v28 }
 0x16e   : > { %v855_v7 = vpop.f32.mrf.mxu3  ;;  %v906_v52 = vpop.f32.mrf.mxu0 }
 0x16f   : > { %1245 = vst [vmem:[%s2375_s18 + $0xb0] sm:$0xff] %v1213_v2  ;;  %v856_v42 = vadd.f32 %v855_v7, %v807_v16 }
 0x170   : > { %v2462_v21 = vpop.f32.mrf.mxu1 }
 0x171   : > { %v905_v54 = vadd.f32 %v904_v30, %v856_v42 }
 0x173   : > { %v1183_v33 = vmul.f32 0.01, %v905_v54  ;;  %v808_v41 = vpop.f32.mrf.mxu2 }
 0x174   : > { %v809_v57 = vadd.f32 %v808_v41, %v2334_v53 }
 0x175   : > { %v1215_v15 = vmax.f32 %v905_v54, %v1183_v33  ;;  %v926_v54 = vadd.f32 %v2369_v20, %v2143_v18 }
 0x176   : > { %v857_v37 = vpop.f32.mrf.mxu3  ;;  %v909_v36 = vpop.f32.mrf.mxu0 }
 0x177   : > { %1247 = vst [vmem:[%s2375_s18 + $0xc0] sm:$0xff] %v1215_v15  ;;  %v858_v31 = vadd.f32 %v857_v37, %v809_v57 }
 0x178   : > { %v2466_v34 = vpop.f32.mrf.mxu1  ;;  %1006 = vmatmul.bf16.gmra.mxu2 %v2618_v1 }
 0x179   : > { %v907_v32 = vadd.f32 %v906_v52, %v858_v31  ;;  %1104 = vmatmul.bf16.gmra.mxu0 %v2619_v11 }
 0x17b   : > { %1055 = vmatmul.bf16.gmra.mxu3 %v2620_v4  ;;  %v1185_v47 = vmul.f32 0.01, %v907_v32  ;;  %1382 = vmatmul.msk.bf16.gmra.mxu1 %vm644_vm0, %v2621_v49  ;;  %v811_v53 = vpop.f32.mrf.mxu2  ;;  %v929_v4 = vadd.f32 %v2378_v50, %v2141_v12 }
 0x17c   : > { %v812_v9 = vadd.f32 %v811_v53, %v2348_v26  ;;  %v2622_v26 = vld [vmem:[#allocation10_spill] sm:$0xff] }
 0x17d   : > { %v1217_v55 = vmax.f32 %v907_v32, %v1185_v47  ;;  %v924_v28 = vadd.f32 %v2623_v62, %v2622_v26 }
 0x17e   : > { %v860_v17 = vpop.f32.mrf.mxu3  ;;  %v911_v46 = vpop.f32.mrf.mxu0 }
 0x17f   : > { %1249 = vst [vmem:[%s2375_s18 + $0xd0] sm:$0xff] %v1217_v55  ;;  %v861_v13 = vadd.f32 %v860_v17, %v812_v9 }
 0x180   : > { %v2475_v5 = vpop.f32.mrf.mxu1 }
 0x181   : > { %v910_v43 = vadd.f32 %v909_v36, %v861_v13 }
 0x183   : > { %v1187_v44 = vmul.f32 0.01, %v910_v43  ;;  %v813_v29 = vpop.f32.mrf.mxu2 }
 0x184   : > { %v814_v24 = vadd.f32 %v813_v29, %v2357_v6 }
 0x185   : > { %v1219_v39 = vmax.f32 %v910_v43, %v1187_v44  ;;  %v931_v43 = vadd.f32 %v2389_v8, %v2175_v38 }
 0x186   : > { %v862_v30 = vpop.f32.mrf.mxu3  ;;  %v1070_v27 = vpop.f32.mrf.mxu0 }
 0x187   : > { %1251 = vst [vmem:[%s2375_s18 + $0xe0] sm:$0xff] %v1219_v39  ;;  %v863_v23 = vadd.f32 %v862_v30, %v814_v24 }
 0x188   : > { %v1119_v48 = vpop.f32.mrf.mxu1 }
 0x189   : > { %v912_v51 = vadd.f32 %v911_v46, %v863_v23 }
 0x18b   : > { %v1189_v59 = vmul.f32 0.01, %v912_v51  ;;  %v972_v45 = vpop.f32.mrf.mxu2 }
 0x18c   : > { %v973_v3 = vadd.f32 %v972_v45, %v924_v28 }
 0x18d   : > { %v1221_v2 = vmax.f32 %v912_v51, %v1189_v59  ;;  %v934_v51 = vadd.f32 %v2395_v25, %v2128_v61 }
 0x18e   : > { %v1021_v16 = vpop.f32.mrf.mxu3  ;;  %v1072_v7 = vpop.f32.mrf.mxu0 }
 0x18f   : > { %1253 = vst [vmem:[%s2375_s18 + $0xf0] sm:$0xff] %v1221_v2  ;;  %v1022_v52 = vadd.f32 %v1021_v16, %v973_v3 }
 0x190   : > { %v1121_v42 = vpop.f32.mrf.mxu1 }
 0x191   : > { %v1071_v6 = vadd.f32 %v1070_v27, %v1022_v52 }
 0x193   : > { %v1120_v33 = vadd.f32 %v1119_v48, %v1071_v6  ;;  %v974_v41 = vpop.f32.mrf.mxu2 }
 0x194   : > { %v975_v57 = vadd.f32 %v974_v41, %v926_v54 }
 0x195   : > { %v1160_v15 = vmul.f32 0.01, %v1120_v33 }
 0x196   : > { %v1023_v37 = vpop.f32.mrf.mxu3  ;;  %v1075_v36 = vpop.f32.mrf.mxu0 }
 0x197   : > { %v1192_v31 = vmax.f32 %v1120_v33, %v1160_v15  ;;  %v1024_v32 = vadd.f32 %v1023_v37, %v975_v57  ;;  %v939_v37 = vadd.f32 %v2412_v10, %v2179_v40 }
 0x198   : > { %v1124_v1 = vpop.f32.mrf.mxu1 }
 0x199   : > { %1224 = vst [vmem:[%s2375_s18 + $0x8] sm:$0xff] %v1192_v31  ;;  %v1073_v11 = vadd.f32 %v1072_v7, %v1024_v32  ;;  %v936_v7 = vadd.f32 %v2406_v35, %v2145_v19 }
 0x19b   : > { %v1122_v47 = vadd.f32 %v1121_v42, %v1073_v11  ;;  %v977_v49 = vpop.f32.mrf.mxu2 }
 0x19c   : > { %v978_v55 = vadd.f32 %v977_v49, %v929_v4 }
 0x19d   : > { %v1162_v53 = vmul.f32 0.01, %v1122_v47 }
 0x19e   : > { %v1026_v18 = vpop.f32.mrf.mxu3  ;;  %v1077_v20 = vpop.f32.mrf.mxu0 }
 0x19f   : > { %v1194_v9 = vmax.f32 %v1122_v47, %v1162_v53  ;;  %v1027_v17 = vadd.f32 %v1026_v18, %v978_v55  ;;  %v941_v53 = vadd.f32 %v2423_v60, %v2199_v0 }
 0x1a0   : > { %v1126_v46 = vpop.f32.mrf.mxu1 }
 0x1a1   : > { %1226 = vst [vmem:[%s2375_s18 + $0x18] sm:$0xff] %v1194_v9  ;;  %v1076_v13 = vadd.f32 %v1075_v36, %v1027_v17 }
 0x1a3   : > { %v1125_v44 = vadd.f32 %v1124_v1, %v1076_v13  ;;  %v979_v29 = vpop.f32.mrf.mxu2 }
 0x1a4   : > { %v980_v24 = vadd.f32 %v979_v29, %v931_v43 }
 0x1a5   : > { %v1164_v39 = vmul.f32 0.01, %v1125_v44 }
 0x1a6   : > { %v1028_v12 = vpop.f32.mrf.mxu3  ;;  %v1080_v50 = vpop.f32.mrf.mxu0 }
 0x1a7   : > { %v1196_v30 = vmax.f32 %v1125_v44, %v1164_v39  ;;  %v1029_v27 = vadd.f32 %v1028_v12, %v980_v24  ;;  %v2624_v44 = vld [vmem:[#allocation11_spill] sm:$0xff] }
 0x1a8   : > { %v1129_v23 = vpop.f32.mrf.mxu1  ;;  %v944_v29 = vadd.f32 %v2427_v63, %v2624_v44 }
 0x1a9   : > { %1228 = vst [vmem:[%s2375_s18 + $0x28] sm:$0xff] %v1196_v30  ;;  %v1078_v48 = vadd.f32 %v1077_v20, %v1029_v27 }
 0x1ab   : > { %v1127_v26 = vadd.f32 %v1126_v46, %v1078_v48  ;;  %v982_v62 = vpop.f32.mrf.mxu2 }
 0x1ac   : > { %v983_v59 = vadd.f32 %v982_v62, %v934_v51  ;;  %v2625_v51 = vld [vmem:[#allocation12_spill] sm:$0xff] }
 0x1ad   : > { %v1166_v28 = vmul.f32 0.01, %v1127_v26 }
 0x1ae   : > { %v1031_v38 = vpop.f32.mrf.mxu3  ;;  %v1082_v8 = vpop.f32.mrf.mxu0 }
 0x1af   : > { %v1198_v45 = vmax.f32 %v1127_v26, %v1166_v28  ;;  %v1032_v2 = vadd.f32 %v1031_v38, %v983_v59  ;;  %v946_v26 = vadd.f32 %v2436_v56, %v2625_v51 }
 0x1b0   : > { %v1131_v3 = vpop.f32.mrf.mxu1 }
 0x1b1   : > { %1230 = vst [vmem:[%s2375_s18 + $0x38] sm:$0xff] %v1198_v45  ;;  %v1081_v16 = vadd.f32 %v1080_v50, %v1032_v2 }
 0x1b3   : > { %v1130_v52 = vadd.f32 %v1129_v23, %v1081_v16  ;;  %v984_v42 = vpop.f32.mrf.mxu2 }
 0x1b4   : > { %v985_v54 = vadd.f32 %v984_v42, %v936_v7  ;;  %v2626_v7 = vld [vmem:[#allocation13_spill] sm:$0xff] }
 0x1b5   : > { %v1168_v6 = vmul.f32 0.01, %v1130_v52 }
 0x1b6   : > { %v1033_v61 = vpop.f32.mrf.mxu3  ;;  %v1085_v25 = vpop.f32.mrf.mxu0 }
 0x1b7   : > { %v1200_v33 = vmax.f32 %v1130_v52, %v1168_v6  ;;  %v1034_v41 = vadd.f32 %v1033_v61, %v985_v54  ;;  %v949_v52 = vadd.f32 %v2440_v14, %v2626_v7 }
 0x1b8   : > { %v1134_v15 = vpop.f32.mrf.mxu1 }
 0x1b9   : > { %1232 = vst [vmem:[%s2375_s18 + $0x48] sm:$0xff] %v1200_v33  ;;  %v1083_v57 = vadd.f32 %v1082_v8, %v1034_v41 }
 0x1bb   : > { %v1132_v36 = vadd.f32 %v1131_v3, %v1083_v57  ;;  %v987_v31 = vpop.f32.mrf.mxu2 }
 0x1bc   : > { %v988_v1 = vadd.f32 %v987_v31, %v939_v37  ;;  %v2627_v37 = vld [vmem:[#allocation14_spill] sm:$0xff] }
 0x1bd   : > { %v1170_v32 = vmul.f32 0.01, %v1132_v36 }
 0x1be   : > { %v1036_v19 = vpop.f32.mrf.mxu3  ;;  %v1087_v35 = vpop.f32.mrf.mxu0 }
 0x1bf   : > { %v1202_v11 = vmax.f32 %v1132_v36, %v1170_v32  ;;  %v1037_v4 = vadd.f32 %v1036_v19, %v988_v1  ;;  %v951_v36 = vadd.f32 %v2449_v22, %v2627_v37 }
 0x1c0   : > { %v1136_v47 = vpop.f32.mrf.mxu1 }
 0x1c1   : > { %1234 = vst [vmem:[%s2375_s18 + $0x58] sm:$0xff] %v1202_v11  ;;  %v1086_v49 = vadd.f32 %v1085_v25, %v1037_v4 }
 0x1c3   : > { %v1135_v55 = vadd.f32 %v1134_v15, %v1086_v49  ;;  %v989_v18 = vpop.f32.mrf.mxu2  ;;  %v2628_v49 = vld [vmem:[#allocation19_spill] sm:$0xff] }
 0x1c4   : > { %v990_v9 = vadd.f32 %v989_v18, %v941_v53  ;;  %v954_v53 = vadd.f32 %v2453_v58, %v2628_v49 }
 0x1c5   : > { %v1172_v20 = vmul.f32 0.01, %v1135_v55 }
 0x1c6   : > { %v1038_v40 = vpop.f32.mrf.mxu3  ;;  %v1090_v10 = vpop.f32.mrf.mxu0 }
 0x1c7   : > { %v1204_v17 = vmax.f32 %v1135_v55, %v1172_v20  ;;  %v1039_v46 = vadd.f32 %v1038_v40, %v990_v9 }
 0x1c8   : > { %v1139_v13 = vpop.f32.mrf.mxu1 }
 0x1c9   : > { %1236 = vst [vmem:[%s2375_s18 + $0x68] sm:$0xff] %v1204_v17  ;;  %v1088_v43 = vadd.f32 %v1087_v35, %v1039_v46 }
 0x1cb   : > { %v1137_v39 = vadd.f32 %v1136_v47, %v1088_v43  ;;  %v992_v24 = vpop.f32.mrf.mxu2 }
 0x1cc   : > { %v993_v50 = vadd.f32 %v992_v24, %v944_v29 }
 0x1cd   : > { %v1174_v12 = vmul.f32 0.01, %v1137_v39 }
 0x1ce   : > { %v1041_v0 = vpop.f32.mrf.mxu3  ;;  %v1092_v60 = vpop.f32.mrf.mxu0 }
 0x1cf   : > { %v1206_v30 = vmax.f32 %v1137_v39, %v1174_v12  ;;  %v1042_v27 = vadd.f32 %v1041_v0, %v993_v50 }
 0x1d0   : > { %v1141_v23 = vpop.f32.mrf.mxu1 }
 0x1d1   : > { %1238 = vst [vmem:[%s2375_s18 + $0x78] sm:$0xff] %v1206_v30  ;;  %v1091_v48 = vadd.f32 %v1090_v10, %v1042_v27  ;;  %v2630_v27 = vld [vmem:[#allocation25_spill] sm:$0xff] }
 0x1d3   : > { %v1140_v62 = vadd.f32 %v1139_v13, %v1091_v48  ;;  %v994_v28 = vpop.f32.mrf.mxu2  ;;  %v2629_v13 = vld [vmem:[#allocation21_spill] sm:$0xff] }
 0x1d4   : > { %v995_v38 = vadd.f32 %v994_v28, %v946_v26  ;;  %v956_v43 = vadd.f32 %v2462_v21, %v2629_v13 }
 0x1d5   : > { %v1176_v59 = vmul.f32 0.01, %v1140_v62 }
 0x1d6   : > { %v1043_v63 = vpop.f32.mrf.mxu3  ;;  %v1095_v8 = vpop.f32.mrf.mxu0 }
 0x1d7   : > { %v1208_v45 = vmax.f32 %v1140_v62, %v1176_v59  ;;  %v1044_v2 = vadd.f32 %v1043_v63, %v995_v38 }
 0x1d8   : > { %v1144_v3 = vpop.f32.mrf.mxu1 }
 0x1d9   : > { %1240 = vst [vmem:[%s2375_s18 + $0x88] sm:$0xff] %v1208_v45  ;;  %v1093_v16 = vadd.f32 %v1092_v60, %v1044_v2  ;;  %v2631_v45 = vld [vmem:[#allocation26_spill] sm:$0xff] }
 0x1da   : > { %v961_v2 = vadd.f32 %v2475_v5, %v2631_v45 }
 0x1db   : > { %v1142_v42 = vadd.f32 %v1141_v23, %v1093_v16  ;;  %v997_v6 = vpop.f32.mrf.mxu2  ;;  %v959_v23 = vadd.f32 %v2466_v34, %v2630_v27 }
 0x1dc   : > { %v998_v61 = vadd.f32 %v997_v6, %v949_v52 }
 0x1dd   : > { %v1178_v54 = vmul.f32 0.01, %v1142_v42 }
 0x1de   : > { %v1046_v56 = vpop.f32.mrf.mxu3  ;;  %v1097_v41 = vpop.f32.mrf.mxu0 }
 0x1df   : > { %v1210_v25 = vmax.f32 %v1142_v42, %v1178_v54  ;;  %v1047_v33 = vadd.f32 %v1046_v56, %v998_v61 }
 0x1e0   : > { %v1146_v57 = vpop.f32.mrf.mxu1 }
 0x1e1   : > { %1242 = vst [vmem:[%s2375_s18 + $0x98] sm:$0xff] %v1210_v25  ;;  %v1096_v15 = vadd.f32 %v1095_v8, %v1047_v33 }
 0x1e3   : > { %v1145_v31 = vadd.f32 %v1144_v3, %v1096_v15  ;;  %v999_v32 = vpop.f32.mrf.mxu2 }
 0x1e4   : > { %v1000_v19 = vadd.f32 %v999_v32, %v951_v36 }
 0x1e5   : > { %v1180_v1 = vmul.f32 0.01, %v1145_v31 }
 0x1e6   : > { %v1048_v14 = vpop.f32.mrf.mxu3  ;;  %v1100_v47 = vpop.f32.mrf.mxu0 }
 0x1e7   : > { %v1212_v35 = vmax.f32 %v1145_v31, %v1180_v1  ;;  %v1049_v11 = vadd.f32 %v1048_v14, %v1000_v19 }
 0x1e8   : > { %v1149_v18 = vpop.f32.mrf.mxu1 }
 0x1e9   : > { %1244 = vst [vmem:[%s2375_s18 + $0xa8] sm:$0xff] %v1212_v35  ;;  %v1098_v4 = vadd.f32 %v1097_v41, %v1049_v11 }
 0x1eb   : > { %v1147_v55 = vadd.f32 %v1146_v57, %v1098_v4  ;;  %v1002_v20 = vpop.f32.mrf.mxu2 }
 0x1ec   : > { %v1003_v40 = vadd.f32 %v1002_v20, %v954_v53 }
 0x1ed   : > { %v1182_v9 = vmul.f32 0.01, %v1147_v55 }
 0x1ee   : > { %v1051_v22 = vpop.f32.mrf.mxu3  ;;  %v1102_v29 = vpop.f32.mrf.mxu0 }
 0x1ef   : > { %v1214_v10 = vmax.f32 %v1147_v55, %v1182_v9  ;;  %v1052_v17 = vadd.f32 %v1051_v22, %v1003_v40 }
 0x1f0   : > { %v1151_v50 = vpop.f32.mrf.mxu1 }
 0x1f1   : > { %1246 = vst [vmem:[%s2375_s18 + $0xb8] sm:$0xff] %v1214_v10  ;;  %v1101_v46 = vadd.f32 %v1100_v47, %v1052_v17 }
 0x1f3   : > { %v1150_v44 = vadd.f32 %v1149_v18, %v1101_v46  ;;  %v1004_v39 = vpop.f32.mrf.mxu2 }
 0x1f4   : > { %v1005_v12 = vadd.f32 %v1004_v39, %v956_v43 }
 0x1f5   : > { %v1184_v24 = vmul.f32 0.01, %v1150_v44 }
 0x1f6   : > { %v1053_v58 = vpop.f32.mrf.mxu3  ;;  %v1105_v28 = vpop.f32.mrf.mxu0 }
 0x1f7   : > { %v1216_v0 = vmax.f32 %v1150_v44, %v1184_v24  ;;  %v1054_v60 = vadd.f32 %v1053_v58, %v1005_v12 }
 0x1f8   : > { %v1154_v63 = vpop.f32.mrf.mxu1 }
 0x1f9   : > { %1248 = vst [vmem:[%s2375_s18 + $0xc8] sm:$0xff] %v1216_v0  ;;  %v1103_v30 = vadd.f32 %v1102_v29, %v1054_v60 }
 0x1fb   : > { %v1152_v48 = vadd.f32 %v1151_v50, %v1103_v30  ;;  %v1007_v51 = vpop.f32.mrf.mxu2 }
 0x1fc   : > { %v1008_v21 = vadd.f32 %v1007_v51, %v959_v23 }
 0x1fd   : > { %v1186_v26 = vmul.f32 0.01, %v1152_v48 }
 0x1fe   : > { %v1056_v62 = vpop.f32.mrf.mxu3  ;;  %v1107_v54 = vpop.f32.mrf.mxu0 }
 0x1ff   : > { %v1218_v59 = vmax.f32 %v1152_v48, %v1186_v26  ;;  %v1057_v38 = vadd.f32 %v1056_v62, %v1008_v21 }
 0x200   : > { %v1156_v56 = vpop.f32.mrf.mxu1 }
 0x201   : > { %1250 = vst [vmem:[%s2375_s18 + $0xd8] sm:$0xff] %v1218_v59  ;;  %v1106_v8 = vadd.f32 %v1105_v28, %v1057_v38 }
 0x203   : > { %v1155_v3 = vadd.f32 %v1154_v63, %v1106_v8  ;;  %v1009_v16 = vpop.f32.mrf.mxu2 }
 0x204   : > { %v1010_v7 = vadd.f32 %v1009_v16, %v961_v2 }
 0x205   : > { %v1188_v34 = vmul.f32 0.01, %v1155_v3 }
 0x206   : > { %v1058_v52 = vpop.f32.mrf.mxu3 }
 0x207   : > { %v1220_v42 = vmax.f32 %v1155_v3, %v1188_v34  ;;  %v1059_v6 = vadd.f32 %v1058_v52, %v1010_v7 }
 0x209   : > { %1252 = vst [vmem:[%s2375_s18 + $0xe8] sm:$0xff] %v1220_v42  ;;  %v1108_v61 = vadd.f32 %v1107_v54, %v1059_v6 }
 0x20b   : > { %v1157_v5 = vadd.f32 %v1156_v56, %v1108_v61 }
 0x20d   : > { %v1190_v25 = vmul.f32 0.01, %v1157_v5 }
 0x20f   : > { %v1222_v33 = vmax.f32 %v1157_v5, %v1190_v25 }
 0x211   : > { %1254 = vst [vmem:[%s2375_s18 + $0xf8] sm:$0xff] %v1222_v33 }
 0x212   : > { %1535 = shalt.err (!%p1532_p13)
}
 0x213   : > { %s1595_s19 = smov 256   ;;  %s1596_s10 = smov 16  }
 0x214   : > { %1410 = dma.vmem_to_hbm [thread:$0]  (%p1668_p9), %s1271_s28, 4096, %s1273_s29, %s1256_s15, %s1595_s19, %s1595_s19, %s1596_s10  }
 0x215 PF: > { %s1287_s11 = sand.u32 1, %s1570_s12   ;;  %p1417_p0 = pnand %p1363_p12, %p1675_p11 }
 0x216   : > { %s1288_s18 = scalar_lea.sflag [#allocation4], %s1287_s11 }
 0x217   : > { %p1418_p1 = pneg %p1417_p0 }
 0x219   : > { %1565 = dma.done.wait (%p1418_p1), %s1288_s18, 4096  }
 0x21a   : > { %1567 = vsyncadd (%p1418_p1), %s1288_s18, 4294963200  ;;  %s19_s17 = sadd.s32 1, %s1590_s17   ;;  %s2632_s12 = smov %s1574_s13 }
 0x21b   : > { %p16_p2 = scmp.ge.s32.totalorder %s19_s17, 4   ;;  %s2633_s13 = smov %s1578_s14 }
 0x21c   : > { %s2634_s14 = smov %s1673_s26  ;;  %s2635_s15 = smov %s1586_s16 }
 0x21d   : > { %s2636_s16 = smov %s2638_s20  ;;  %18 = sbr.rel (!%p16_p2) target bundleno = 6 (0x6), region = 77 }
 0x222   :  { %1294 = vsyncpa [#allocation3], 1 }
 0x223   :  { %1296 = vsyncpa [#allocation3 + $0x1], 1 }
 0x224   :  { %1297 = vsyncpa [#allocation4], 1 }
 0x225   :  { %1299 = vsyncpa [#allocation4 + $0x1], 1 }

</bundles_post_ra>
